<compile_context>
chip_gen: v7x
topology: tpu7x:2x2x1
jax: 0.10.0
libtpu: 0.0.40
codegen_flags: <defaults>
</compile_context>

<pallas_src>
import functools

import jax
import jax.numpy as jnp
import numpy as np
from jax.experimental import pallas as pl
from jax.experimental.pallas import tpu as pltpu


# -----------------------------------------------------------------------------
# pltpu.roll rotation-convention probe (run once, eagerly).  Guarantees the
# conv taps can never be silently shifted the wrong way and falls back to a
# slice+concat roll if the XLU rotate is unavailable for this shape.
# -----------------------------------------------------------------------------
_ROLL_SIGN = None  # +1: pltpu.roll matches jnp.roll; -1: opposite; 0: fallback.


def _probe_roll_sign(hw):
    global _ROLL_SIGN
    if _ROLL_SIGN is not None:
        return _ROLL_SIGN
    shift = (hw - 17) % hw
    if shift == 0 or 2 * shift == hw:
        shift = 1
    try:
        def probe(x_ref, o_ref):
            o_ref[...] = pltpu.roll(x_ref[...], shift, 1)

        x = jnp.broadcast_to(jnp.arange(hw, dtype=jnp.float32), (8, hw))
        out = pl.pallas_call(
            probe, out_shape=jax.ShapeDtypeStruct((8, hw), jnp.float32)
        )(x)
        v = int(round(float(out[0, 0])))
        if v == (hw - shift) % hw:        # out[i] = x[i - shift]  (jnp.roll)
            _ROLL_SIGN = 1
        elif v == shift % hw:             # out[i] = x[i + shift]
            _ROLL_SIGN = -1
        else:
            _ROLL_SIGN = 0
    except Exception:
        _ROLL_SIGN = 0
    return _ROLL_SIGN


def make_cbam_kernel(bt, C, H, W, mid, ksize, roll_sign):
    p = (ksize - 1) // 2
    HW = H * W

    def flat_shift(v, s):
        """u[:, i] = v[:, (i + s) mod HW] for a (bt, HW) array (lane rotate)."""
        s = s % HW
        if s == 0:
            return v
        if roll_sign == 1:
            return pltpu.roll(v, (HW - s) % HW, 1)
        if roll_sign == -1:
            return pltpu.roll(v, s, 1)
        return jnp.roll(v, -s, axis=1)   # guaranteed-portable fallback

    def kernel(x_ref, w1_ref, b1_ref, w2_ref, b2_ref, wc_ref, bc_ref, out_ref):
        x = x_ref[...].astype(jnp.float32)                     # (bt, C, HW)

        # ----------------- Channel attention (VPU only) -----------------
        avg = jnp.mean(x, axis=2)                              # (bt, C)
        mx = jnp.max(x, axis=2)                                # (bt, C)

        w1 = w1_ref[...]                                       # (mid, C)
        b1 = b1_ref[...]                                       # (1, mid)
        w2 = w2_ref[...]                                       # (C, mid)
        b2 = b2_ref[...]                                       # (1, C)

        def shared_mlp(v):                                     # v: (bt, C)
            h = jnp.sum(v[:, None, :] * w1[None, :, :], axis=2) + b1   # (bt, mid)
            h = jnp.maximum(h, 0.0)
            return jnp.sum(h[:, None, :] * w2[None, :, :], axis=2) + b2  # (bt, C)

        att_c = jax.nn.sigmoid(shared_mlp(avg) + shared_mlp(mx))        # (bt, C)
        fp = x * att_c[:, :, None]                                      # (bt, C, HW)

        # ----------------- Spatial attention -----------------
        cmax = jnp.max(fp, axis=1)                             # (bt, HW) conv ch0
        cmean = jnp.mean(fp, axis=1)                           # (bt, HW) conv ch1

        # Per-pixel (row, col) coordinates in the flattened layout, built once.
        lin = jax.lax.broadcasted_iota(jnp.int32, (1, HW), 1)
        if W & (W - 1) == 0:
            col = jnp.bitwise_and(lin, W - 1)
            row = jnp.right_shift(lin, W.bit_length() - 1)
        else:
            col = lin % W
            row = lin // W

        # Read all 2*k*k conv weights (SMEM scalars) once, outside the taps.
        wvals = [wc_ref[i] for i in range(2 * ksize * ksize)]

        # k independent accumulators (one per conv row) -> VALU ILP instead of
        # one serial 2*k*k-long dependent add chain.
        row_accs = []
        for dy in range(ksize):
            dyo = dy - p
            acc = None
            for dx in range(ksize):
                dxo = dx - p
                s = dyo * W + dxo
                t_max = flat_shift(cmax, s)
                t_mean = flat_shift(cmean, s)
                w_max = wvals[(0 * ksize + dy) * ksize + dx]
                w_mean = wvals[(1 * ksize + dy) * ksize + dx]
                contrib = t_max * w_max + t_mean * w_mean      # (bt, HW)
                # Zero "SAME" padding: mask taps whose source pixel is outside
                # the image (this also kills the circular-shift wrap-around).
                conds = []
                if dxo > 0:
                    conds.append(col < (W - dxo))
                elif dxo < 0:
                    conds.append(col >= (-dxo))
                if dyo > 0:
                    conds.append(row < (H - dyo))
                elif dyo < 0:
                    conds.append(row >= (-dyo))
                if conds:
                    m = functools.reduce(jnp.logical_and, conds)
                    contrib = jnp.where(m, contrib, 0.0)
                acc = contrib if acc is None else acc + contrib
            row_accs.append(acc)

        conv = functools.reduce(jnp.add, row_accs) + bc_ref[0]
        spat = jax.nn.sigmoid(conv)                            # (bt, HW)

        out_ref[...] = (fp * spat[:, None, :]).astype(out_ref.dtype)

    return kernel


def cbam_forward(x, w1, b1, w2, b2, wc, bc):
    """x:(B,C,H,W) f32. w1:(mid,C) b1:(mid,) w2:(C,mid) b2:(C,) wc:(1,2,k,k) bc:(1,)."""
    B, C, H, W = x.shape
    mid = w1.shape[0]
    ksize = wc.shape[-1]
    HW = H * W

    # Lane-dense layout: flatten spatial dims so the last (lane) dim is a
    # multiple of 128 -> full-width VPU ops and unmasked vector stores.
    x_flat = x.reshape(B, C, HW)
    wc_flat = wc.reshape(-1)          # (2*k*k,), order [c][dy][dx]
    b1_2 = b1.reshape(1, mid)
    b2_2 = b2.reshape(1, C)

    # Batch tiling: B/2 images per step amortizes per-step pipeline overhead
    # for larger batches while still exposing 2 parallel grid steps for the
    # two v7x TensorCores. (For odd / size-1 batches, one step holds it all.)
    n_steps = 2 if (B >= 2 and B % 2 == 0) else 1
    bt = B // n_steps

    roll_sign = _probe_roll_sign(HW)
    kernel = make_cbam_kernel(bt, C, H, W, mid, ksize, roll_sign)

    out_flat = pl.pallas_call(
        kernel,
        out_shape=jax.ShapeDtypeStruct((B, C, HW), x.dtype),
        grid_spec=pltpu.PrefetchScalarGridSpec(
            num_scalar_prefetch=0,
            grid=(n_steps,),
            in_specs=[
                pl.BlockSpec((bt, C, HW), lambda i: (i, 0, 0)),
                pl.BlockSpec((mid, C), lambda i: (0, 0)),
                pl.BlockSpec((1, mid), lambda i: (0, 0)),
                pl.BlockSpec((C, mid), lambda i: (0, 0)),
                pl.BlockSpec((1, C), lambda i: (0, 0)),
                pl.BlockSpec(memory_space=pltpu.MemorySpace.SMEM),  # conv weights
                pl.BlockSpec(memory_space=pltpu.MemorySpace.SMEM),  # conv bias
            ],
            out_specs=pl.BlockSpec((bt, C, HW), lambda i: (i, 0, 0)),
        ),
        # TODO(synk): for production-scale C/H/W, set vmem_limit_bytes and tile
        # over H (with a p-row halo) instead of keeping whole images resident.
        compiler_params=pltpu.CompilerParams(dimension_semantics=("parallel",)),
    )(x_flat, w1, b1_2, w2, b2_2, wc_flat, bc)

    return out_flat.reshape(B, C, H, W)


def cbam_reference(x, w1, b1, w2, b2, wc, bc):
    """Pure-JAX reference matching the PyTorch forward exactly."""
    avg = x.mean(axis=(2, 3))
    mx = x.max(axis=(2, 3))

    def mlp(v):
        return jnp.maximum(v @ w1.T + b1, 0.0) @ w2.T + b2

    att_c = jax.nn.sigmoid(mlp(avg) + mlp(mx))[:, :, None, None]
    fp = att_c * x

    cmax = fp.max(axis=1, keepdims=True)
    cmean = fp.mean(axis=1, keepdims=True)
    pool = jnp.concatenate([cmax, cmean], axis=1)
    conv = jax.lax.conv_general_dilated(
        pool, wc, window_strides=(1, 1), padding="SAME",
        dimension_numbers=("NCHW", "OIHW", "NCHW"),
    ) + bc.reshape(1, 1, 1, 1)
    att_s = jax.nn.sigmoid(conv)
    return att_s * fp


if __name__ == "__main__":
    B, C, H, W = 2, 4, 16, 16
    reduction_ratio = 2
    kernel_size = 3
    mid = int(C / float(reduction_ratio))

    key = jax.random.PRNGKey(0)
    ks = jax.random.split(key, 7)
    # deterministic synthetic parameters (no checkpoint load)
    w1 = jax.random.normal(ks[0], (mid, C), jnp.float32) * 0.3
    b1 = jax.random.normal(ks[1], (mid,), jnp.float32) * 0.1
    w2 = jax.random.normal(ks[2], (C, mid), jnp.float32) * 0.3
    b2 = jax.random.normal(ks[3], (C,), jnp.float32) * 0.1
    wc = jax.random.normal(ks[4], (1, 2, kernel_size, kernel_size), jnp.float32) * 0.3
    bc = jax.random.normal(ks[5], (1,), jnp.float32) * 0.1

    x = jax.random.normal(ks[6], (B, C, H, W), jnp.float32)

    out = cbam_forward(x, w1, b1, w2, b2, wc, bc)
    out = jax.block_until_ready(out)

    ref = jax.block_until_ready(cbam_reference(x, w1, b1, w2, b2, wc, bc))
    np.testing.assert_allclose(np.asarray(out), np.asarray(ref), rtol=1e-5, atol=1e-5)

    print("KERNEL_OK")
</pallas_src>

<mosaic_0001>
module attributes {stable_mosaic.version = 11 : i64} {
  func.func @probe(%arg0: memref<8x256xf32, #tpu.memory_space<vmem>>, %arg1: memref<8x256xf32, #tpu.memory_space<vmem>>) attributes {dimension_semantics = [], scalar_prefetch = 0 : i64, scratch_operands = 0 : i64, tpu.core_type = #tpu.core_type<tc>} {
    %c0 = arith.constant 0 : index
    %c0_0 = arith.constant 0 : index
    %0 = vector.load %arg0[%c0, %c0_0] : memref<8x256xf32, #tpu.memory_space<vmem>>, vector<8x256xf32>
    %c239_i32 = arith.constant 239 : i32
    %1 = tpu.dynamic_rotate %0 by %c239_i32 dim 1 : vector<8x256xf32>, i32 -> vector<8x256xf32>
    %c0_1 = arith.constant 0 : index
    %c0_2 = arith.constant 0 : index
    %2 = vector.load %arg1[%c0_1, %c0_2] : memref<8x256xf32, #tpu.memory_space<vmem>>, vector<8x256xf32>
    tpu.vector_store %arg1[%c0_1, %c0_2], %1 {strides = array<i32>} : memref<8x256xf32, #tpu.memory_space<vmem>>, vector<8x256xf32>,
    return
  }
}

module attributes {stable_mosaic.version = 11 : i64} {
  func.func @kernel(%arg0: i32, %arg1: memref<1x4x256xf32, #tpu.memory_space<vmem>>, %arg2: memref<2x4xf32, #tpu.memory_space<vmem>>, %arg3: memref<1x2xf32, #tpu.memory_space<vmem>>, %arg4: memref<4x2xf32, #tpu.memory_space<vmem>>, %arg5: memref<1x4xf32, #tpu.memory_space<vmem>>, %arg6: memref<18xf32, #tpu.memory_space<smem>>, %arg7: memref<1xf32, #tpu.memory_space<smem>>, %arg8: memref<1x4x256xf32, #tpu.memory_space<vmem>>) attributes {dimension_semantics = [#tpu.dimension_semantics<parallel>], iteration_bounds = array<i64: 2>, scalar_prefetch = 0 : i64, scratch_operands = 0 : i64, tpu.core_type = #tpu.core_type<tc>, window_params = [{transform_indices = @transform_0, window_bounds = array<i64: 1, 4, 256>}, {pipeline_mode = #tpu.pipeline_mode<synchronous>, transform_indices = @transform_1, window_bounds = array<i64: 2, 4>}, {pipeline_mode = #tpu.pipeline_mode<synchronous>, transform_indices = @transform_2, window_bounds = array<i64: 1, 2>}, {pipeline_mode = #tpu.pipeline_mode<synchronous>, transform_indices = @transform_3, window_bounds = array<i64: 4, 2>}, {pipeline_mode = #tpu.pipeline_mode<synchronous>, transform_indices = @transform_4, window_bounds = array<i64: 1, 4>}, {transform_indices = @transform_5, window_bounds = array<i64: 18>}, {transform_indices = @transform_6, window_bounds = array<i64: 1>}, {transform_indices = @transform_7, window_bounds = array<i64: 1, 4, 256>}]} {
    %c0 = arith.constant 0 : index
    %c0_0 = arith.constant 0 : index
    %c0_1 = arith.constant 0 : index
    %0 = vector.load %arg1[%c0, %c0_0, %c0_1] : memref<1x4x256xf32, #tpu.memory_space<vmem>>, vector<1x4x256xf32>
    %cst = arith.constant dense<0.000000e+00> : vector<1x4xf32>
    %1 = vector.multi_reduction <add>, %0, %cst [2] : vector<1x4x256xf32> to vector<1x4xf32>
    %cst_2 = arith.constant 2.560000e+02 : f32
    %2 = vector.broadcast %cst_2 : f32 to vector<1x4xf32>
    %3 = arith.divf %1, %2 : vector<1x4xf32>
    %cst_3 = arith.constant dense<0xFF800000> : vector<1x4xf32>
    %4 = vector.multi_reduction <maximumf>, %0, %cst_3 [2] : vector<1x4x256xf32> to vector<1x4xf32>
    %c0_4 = arith.constant 0 : index
    %c0_5 = arith.constant 0 : index
    %5 = vector.load %arg2[%c0_4, %c0_5] : memref<2x4xf32, #tpu.memory_space<vmem>>, vector<2x4xf32>
    %c0_6 = arith.constant 0 : index
    %c0_7 = arith.constant 0 : index
    %6 = vector.load %arg3[%c0_6, %c0_7] : memref<1x2xf32, #tpu.memory_space<vmem>>, vector<1x2xf32>
    %c0_8 = arith.constant 0 : index
    %c0_9 = arith.constant 0 : index
    %7 = vector.load %arg4[%c0_8, %c0_9] : memref<4x2xf32, #tpu.memory_space<vmem>>, vector<4x2xf32>
    %c0_10 = arith.constant 0 : index
    %c0_11 = arith.constant 0 : index
    %8 = vector.load %arg5[%c0_10, %c0_11] : memref<1x4xf32, #tpu.memory_space<vmem>>, vector<1x4xf32>
    %9 = vector.shape_cast %3 : vector<1x4xf32> to vector<1x1x4xf32>
    %10 = vector.shape_cast %5 : vector<2x4xf32> to vector<1x2x4xf32>
    %11 = vector.broadcast %9 : vector<1x1x4xf32> to vector<1x2x4xf32>
    %12 = arith.mulf %11, %10 : vector<1x2x4xf32>
    %cst_12 = arith.constant dense<0.000000e+00> : vector<1x2xf32>
    %13 = vector.multi_reduction <add>, %12, %cst_12 [2] : vector<1x2x4xf32> to vector<1x2xf32>
    %14 = arith.addf %13, %6 : vector<1x2xf32>
    %cst_13 = arith.constant 0.000000e+00 : f32
    %15 = vector.broadcast %cst_13 : f32 to vector<1x2xf32>
    %16 = arith.maximumf %14, %15 : vector<1x2xf32>
    %17 = vector.shape_cast %16 : vector<1x2xf32> to vector<1x1x2xf32>
    %18 = vector.shape_cast %7 : vector<4x2xf32> to vector<1x4x2xf32>
    %19 = vector.broadcast %17 : vector<1x1x2xf32> to vector<1x4x2xf32>
    %20 = arith.mulf %19, %18 : vector<1x4x2xf32>
    %cst_14 = arith.constant dense<0.000000e+00> : vector<1x4xf32>
    %21 = vector.multi_reduction <add>, %20, %cst_14 [2] : vector<1x4x2xf32> to vector<1x4xf32>
    %22 = arith.addf %21, %8 : vector<1x4xf32>
    %23 = vector.shape_cast %4 : vector<1x4xf32> to vector<1x1x4xf32>
    %24 = vector.shape_cast %5 : vector<2x4xf32> to vector<1x2x4xf32>
    %25 = vector.broadcast %23 : vector<1x1x4xf32> to vector<1x2x4xf32>
    %26 = arith.mulf %25, %24 : vector<1x2x4xf32>
    %cst_15 = arith.constant dense<0.000000e+00> : vector<1x2xf32>
    %27 = vector.multi_reduction <add>, %26, %cst_15 [2] : vector<1x2x4xf32> to vector<1x2xf32>
    %28 = arith.addf %27, %6 : vector<1x2xf32>
    %cst_16 = arith.constant 0.000000e+00 : f32
    %29 = vector.broadcast %cst_16 : f32 to vector<1x2xf32>
    %30 = arith.maximumf %28, %29 : vector<1x2xf32>
    %31 = vector.shape_cast %30 : vector<1x2xf32> to vector<1x1x2xf32>
    %32 = vector.shape_cast %7 : vector<4x2xf32> to vector<1x4x2xf32>
    %33 = vector.broadcast %31 : vector<1x1x2xf32> to vector<1x4x2xf32>
    %34 = arith.mulf %33, %32 : vector<1x4x2xf32>
    %cst_17 = arith.constant dense<0.000000e+00> : vector<1x4xf32>
    %35 = vector.multi_reduction <add>, %34, %cst_17 [2] : vector<1x4x2xf32> to vector<1x4xf32>
    %36 = arith.addf %35, %8 : vector<1x4xf32>
    %37 = arith.addf %22, %36 : vector<1x4xf32>
    %38 = arith.negf %37 : vector<1x4xf32>
    %39 = math.exp %38 : vector<1x4xf32>
    %cst_18 = arith.constant 1.000000e+00 : f32
    %40 = vector.broadcast %cst_18 : f32 to vector<1x4xf32>
    %41 = arith.addf %40, %39 : vector<1x4xf32>
    %42 = arith.divf %40, %41 : vector<1x4xf32>
    %43 = vector.shape_cast %42 : vector<1x4xf32> to vector<1x4x1xf32>
    %44 = vector.broadcast %43 : vector<1x4x1xf32> to vector<1x4x256xf32>
    %45 = arith.mulf %0, %44 : vector<1x4x256xf32>
    %cst_19 = arith.constant dense<0xFF800000> : vector<1x256xf32>
    %46 = vector.multi_reduction <maximumf>, %45, %cst_19 [1] : vector<1x4x256xf32> to vector<1x256xf32>
    %cst_20 = arith.constant dense<0.000000e+00> : vector<1x256xf32>
    %47 = vector.multi_reduction <add>, %45, %cst_20 [1] : vector<1x4x256xf32> to vector<1x256xf32>
    %cst_21 = arith.constant 4.000000e+00 : f32
    %48 = vector.broadcast %cst_21 : f32 to vector<1x256xf32>
    %49 = arith.divf %47, %48 : vector<1x256xf32>
    %50 = tpu.iota {dimensions = array<i32: 1>} : vector<1x256xi32>
    %c15_i32 = arith.constant 15 : i32
    %51 = vector.broadcast %c15_i32 : i32 to vector<1x256xi32>
    %52 = arith.andi %50, %51 : vector<1x256xi32>
    %c4_i32 = arith.constant 4 : i32
    %53 = vector.broadcast %c4_i32 : i32 to vector<1x256xi32>
    %54 = arith.shrsi %50, %53 : vector<1x256xi32>
    %c0_22 = arith.constant 0 : index
    %55 = memref.load %arg6[%c0_22] : memref<18xf32, #tpu.memory_space<smem>>
    %c1 = arith.constant 1 : index
    %56 = memref.load %arg6[%c1] : memref<18xf32, #tpu.memory_space<smem>>
    %c2 = arith.constant 2 : index
    %57 = memref.load %arg6[%c2] : memref<18xf32, #tpu.memory_space<smem>>
    %c3 = arith.constant 3 : index
    %58 = memref.load %arg6[%c3] : memref<18xf32, #tpu.memory_space<smem>>
    %c4 = arith.constant 4 : index
    %59 = memref.load %arg6[%c4] : memref<18xf32, #tpu.memory_space<smem>>
    %c5 = arith.constant 5 : index
    %60 = memref.load %arg6[%c5] : memref<18xf32, #tpu.memory_space<smem>>
    %c6 = arith.constant 6 : index
    %61 = memref.load %arg6[%c6] : memref<18xf32, #tpu.memory_space<smem>>
    %c7 = arith.constant 7 : index
    %62 = memref.load %arg6[%c7] : memref<18xf32, #tpu.memory_space<smem>>
    %c8 = arith.constant 8 : index
    %63 = memref.load %arg6[%c8] : memref<18xf32, #tpu.memory_space<smem>>
    %c9 = arith.constant 9 : index
    %64 = memref.load %arg6[%c9] : memref<18xf32, #tpu.memory_space<smem>>
    %c10 = arith.constant 10 : index
    %65 = memref.load %arg6[%c10] : memref<18xf32, #tpu.memory_space<smem>>
    %c11 = arith.constant 11 : index
    %66 = memref.load %arg6[%c11] : memref<18xf32, #tpu.memory_space<smem>>
    %c12 = arith.constant 12 : index
    %67 = memref.load %arg6[%c12] : memref<18xf32, #tpu.memory_space<smem>>
    %c13 = arith.constant 13 : index
    %68 = memref.load %arg6[%c13] : memref<18xf32, #tpu.memory_space<smem>>
    %c14 = arith.constant 14 : index
    %69 = memref.load %arg6[%c14] : memref<18xf32, #tpu.memory_space<smem>>
    %c15 = arith.constant 15 : index
    %70 = memref.load %arg6[%c15] : memref<18xf32, #tpu.memory_space<smem>>
    %c16 = arith.constant 16 : index
    %71 = memref.load %arg6[%c16] : memref<18xf32, #tpu.memory_space<smem>>
    %c17 = arith.constant 17 : index
    %72 = memref.load %arg6[%c17] : memref<18xf32, #tpu.memory_space<smem>>
    %73 = vector.extract_strided_slice %46 {offsets = [0, 239], sizes = [1, 17], strides = [1, 1]} : vector<1x256xf32> to vector<1x17xf32>
    %74 = vector.extract_strided_slice %46 {offsets = [0, 0], sizes = [1, 239], strides = [1, 1]} : vector<1x256xf32> to vector<1x239xf32>
    %75 = tpu.concatenate %73, %74 in 1 : vector<1x17xf32>, vector<1x239xf32> -> vector<1x256xf32>
    %76 = vector.extract_strided_slice %49 {offsets = [0, 239], sizes = [1, 17], strides = [1, 1]} : vector<1x256xf32> to vector<1x17xf32>
    %77 = vector.extract_strided_slice %49 {offsets = [0, 0], sizes = [1, 239], strides = [1, 1]} : vector<1x256xf32> to vector<1x239xf32>
    %78 = tpu.concatenate %76, %77 in 1 : vector<1x17xf32>, vector<1x239xf32> -> vector<1x256xf32>
    %79 = vector.broadcast %55 : f32 to vector<1x256xf32>
    %80 = arith.mulf %75, %79 : vector<1x256xf32>
    %81 = vector.broadcast %64 : f32 to vector<1x256xf32>
    %82 = arith.mulf %78, %81 : vector<1x256xf32>
    %83 = arith.addf %80, %82 : vector<1x256xf32>
    %c1_i32 = arith.constant 1 : i32
    %84 = vector.broadcast %c1_i32 : i32 to vector<1x256xi32>
    %85 = arith.cmpi sge, %52, %84 : vector<1x256xi32>
    %c1_i32_23 = arith.constant 1 : i32
    %86 = vector.broadcast %c1_i32_23 : i32 to vector<1x256xi32>
    %87 = arith.cmpi sge, %54, %86 : vector<1x256xi32>
    %88 = arith.andi %85, %87 : vector<1x256xi1>
    %cst_24 = arith.constant 0.000000e+00 : f32
    %89 = vector.broadcast %cst_24 : f32 to vector<1x256xf32>
    %90 = arith.select %88, %83, %89 : vector<1x256xi1>, vector<1x256xf32>
    %91 = vector.extract_strided_slice %46 {offsets = [0, 240], sizes = [1, 16], strides = [1, 1]} : vector<1x256xf32> to vector<1x16xf32>
    %92 = vector.extract_strided_slice %46 {offsets = [0, 0], sizes = [1, 240], strides = [1, 1]} : vector<1x256xf32> to vector<1x240xf32>
    %93 = tpu.concatenate %91, %92 in 1 : vector<1x16xf32>, vector<1x240xf32> -> vector<1x256xf32>
    %94 = vector.extract_strided_slice %49 {offsets = [0, 240], sizes = [1, 16], strides = [1, 1]} : vector<1x256xf32> to vector<1x16xf32>
    %95 = vector.extract_strided_slice %49 {offsets = [0, 0], sizes = [1, 240], strides = [1, 1]} : vector<1x256xf32> to vector<1x240xf32>
    %96 = tpu.concatenate %94, %95 in 1 : vector<1x16xf32>, vector<1x240xf32> -> vector<1x256xf32>
    %97 = vector.broadcast %56 : f32 to vector<1x256xf32>
    %98 = arith.mulf %93, %97 : vector<1x256xf32>
    %99 = vector.broadcast %65 : f32 to vector<1x256xf32>
    %100 = arith.mulf %96, %99 : vector<1x256xf32>
    %101 = arith.addf %98, %100 : vector<1x256xf32>
    %c1_i32_25 = arith.constant 1 : i32
    %102 = vector.broadcast %c1_i32_25 : i32 to vector<1x256xi32>
    %103 = arith.cmpi sge, %54, %102 : vector<1x256xi32>
    %cst_26 = arith.constant 0.000000e+00 : f32
    %104 = vector.broadcast %cst_26 : f32 to vector<1x256xf32>
    %105 = arith.select %103, %101, %104 : vector<1x256xi1>, vector<1x256xf32>
    %106 = arith.addf %90, %105 : vector<1x256xf32>
    %107 = vector.extract_strided_slice %46 {offsets = [0, 241], sizes = [1, 15], strides = [1, 1]} : vector<1x256xf32> to vector<1x15xf32>
    %108 = vector.extract_strided_slice %46 {offsets = [0, 0], sizes = [1, 241], strides = [1, 1]} : vector<1x256xf32> to vector<1x241xf32>
    %109 = tpu.concatenate %107, %108 in 1 : vector<1x15xf32>, vector<1x241xf32> -> vector<1x256xf32>
    %110 = vector.extract_strided_slice %49 {offsets = [0, 241], sizes = [1, 15], strides = [1, 1]} : vector<1x256xf32> to vector<1x15xf32>
    %111 = vector.extract_strided_slice %49 {offsets = [0, 0], sizes = [1, 241], strides = [1, 1]} : vector<1x256xf32> to vector<1x241xf32>
    %112 = tpu.concatenate %110, %111 in 1 : vector<1x15xf32>, vector<1x241xf32> -> vector<1x256xf32>
    %113 = vector.broadcast %57 : f32 to vector<1x256xf32>
    %114 = arith.mulf %109, %113 : vector<1x256xf32>
    %115 = vector.broadcast %66 : f32 to vector<1x256xf32>
    %116 = arith.mulf %112, %115 : vector<1x256xf32>
    %117 = arith.addf %114, %116 : vector<1x256xf32>
    %c15_i32_27 = arith.constant 15 : i32
    %118 = vector.broadcast %c15_i32_27 : i32 to vector<1x256xi32>
    %119 = arith.cmpi slt, %52, %118 : vector<1x256xi32>
    %c1_i32_28 = arith.constant 1 : i32
    %120 = vector.broadcast %c1_i32_28 : i32 to vector<1x256xi32>
    %121 = arith.cmpi sge, %54, %120 : vector<1x256xi32>
    %122 = arith.andi %119, %121 : vector<1x256xi1>
    %cst_29 = arith.constant 0.000000e+00 : f32
    %123 = vector.broadcast %cst_29 : f32 to vector<1x256xf32>
    %124 = arith.select %122, %117, %123 : vector<1x256xi1>, vector<1x256xf32>
    %125 = arith.addf %106, %124 : vector<1x256xf32>
    %126 = vector.extract_strided_slice %46 {offsets = [0, 255], sizes = [1, 1], strides = [1, 1]} : vector<1x256xf32> to vector<1x1xf32>
    %127 = vector.extract_strided_slice %46 {offsets = [0, 0], sizes = [1, 255], strides = [1, 1]} : vector<1x256xf32> to vector<1x255xf32>
    %128 = tpu.concatenate %126, %127 in 1 : vector<1x1xf32>, vector<1x255xf32> -> vector<1x256xf32>
    %129 = vector.extract_strided_slice %49 {offsets = [0, 255], sizes = [1, 1], strides = [1, 1]} : vector<1x256xf32> to vector<1x1xf32>
    %130 = vector.extract_strided_slice %49 {offsets = [0, 0], sizes = [1, 255], strides = [1, 1]} : vector<1x256xf32> to vector<1x255xf32>
    %131 = tpu.concatenate %129, %130 in 1 : vector<1x1xf32>, vector<1x255xf32> -> vector<1x256xf32>
    %132 = vector.broadcast %58 : f32 to vector<1x256xf32>
    %133 = arith.mulf %128, %132 : vector<1x256xf32>
    %134 = vector.broadcast %67 : f32 to vector<1x256xf32>
    %135 = arith.mulf %131, %134 : vector<1x256xf32>
    %136 = arith.addf %133, %135 : vector<1x256xf32>
    %c1_i32_30 = arith.constant 1 : i32
    %137 = vector.broadcast %c1_i32_30 : i32 to vector<1x256xi32>
    %138 = arith.cmpi sge, %52, %137 : vector<1x256xi32>
    %cst_31 = arith.constant 0.000000e+00 : f32
    %139 = vector.broadcast %cst_31 : f32 to vector<1x256xf32>
    %140 = arith.select %138, %136, %139 : vector<1x256xi1>, vector<1x256xf32>
    %141 = vector.broadcast %59 : f32 to vector<1x256xf32>
    %142 = arith.mulf %46, %141 : vector<1x256xf32>
    %143 = vector.broadcast %68 : f32 to vector<1x256xf32>
    %144 = arith.mulf %49, %143 : vector<1x256xf32>
    %145 = arith.addf %142, %144 : vector<1x256xf32>
    %146 = arith.addf %140, %145 : vector<1x256xf32>
    %147 = vector.extract_strided_slice %46 {offsets = [0, 1], sizes = [1, 255], strides = [1, 1]} : vector<1x256xf32> to vector<1x255xf32>
    %148 = vector.extract_strided_slice %46 {offsets = [0, 0], sizes = [1, 1], strides = [1, 1]} : vector<1x256xf32> to vector<1x1xf32>
    %149 = tpu.concatenate %147, %148 in 1 : vector<1x255xf32>, vector<1x1xf32> -> vector<1x256xf32>
    %150 = vector.extract_strided_slice %49 {offsets = [0, 1], sizes = [1, 255], strides = [1, 1]} : vector<1x256xf32> to vector<1x255xf32>
    %151 = vector.extract_strided_slice %49 {offsets = [0, 0], sizes = [1, 1], strides = [1, 1]} : vector<1x256xf32> to vector<1x1xf32>
    %152 = tpu.concatenate %150, %151 in 1 : vector<1x255xf32>, vector<1x1xf32> -> vector<1x256xf32>
    %153 = vector.broadcast %60 : f32 to vector<1x256xf32>
    %154 = arith.mulf %149, %153 : vector<1x256xf32>
    %155 = vector.broadcast %69 : f32 to vector<1x256xf32>
    %156 = arith.mulf %152, %155 : vector<1x256xf32>
    %157 = arith.addf %154, %156 : vector<1x256xf32>
    %c15_i32_32 = arith.constant 15 : i32
    %158 = vector.broadcast %c15_i32_32 : i32 to vector<1x256xi32>
    %159 = arith.cmpi slt, %52, %158 : vector<1x256xi32>
    %cst_33 = arith.constant 0.000000e+00 : f32
    %160 = vector.broadcast %cst_33 : f32 to vector<1x256xf32>
    %161 = arith.select %159, %157, %160 : vector<1x256xi1>, vector<1x256xf32>
    %162 = arith.addf %146, %161 : vector<1x256xf32>
    %163 = vector.extract_strided_slice %46 {offsets = [0, 15], sizes = [1, 241], strides = [1, 1]} : vector<1x256xf32> to vector<1x241xf32>
    %164 = vector.extract_strided_slice %46 {offsets = [0, 0], sizes = [1, 15], strides = [1, 1]} : vector<1x256xf32> to vector<1x15xf32>
    %165 = tpu.concatenate %163, %164 in 1 : vector<1x241xf32>, vector<1x15xf32> -> vector<1x256xf32>
    %166 = vector.extract_strided_slice %49 {offsets = [0, 15], sizes = [1, 241], strides = [1, 1]} : vector<1x256xf32> to vector<1x241xf32>
    %167 = vector.extract_strided_slice %49 {offsets = [0, 0], sizes = [1, 15], strides = [1, 1]} : vector<1x256xf32> to vector<1x15xf32>
    %168 = tpu.concatenate %166, %167 in 1 : vector<1x241xf32>, vector<1x15xf32> -> vector<1x256xf32>
    %169 = vector.broadcast %61 : f32 to vector<1x256xf32>
    %170 = arith.mulf %165, %169 : vector<1x256xf32>
    %171 = vector.broadcast %70 : f32 to vector<1x256xf32>
    %172 = arith.mulf %168, %171 : vector<1x256xf32>
    %173 = arith.addf %170, %172 : vector<1x256xf32>
    %c1_i32_34 = arith.constant 1 : i32
    %174 = vector.broadcast %c1_i32_34 : i32 to vector<1x256xi32>
    %175 = arith.cmpi sge, %52, %174 : vector<1x256xi32>
    %c15_i32_35 = arith.constant 15 : i32
    %176 = vector.broadcast %c15_i32_35 : i32 to vector<1x256xi32>
    %177 = arith.cmpi slt, %54, %176 : vector<1x256xi32>
    %178 = arith.andi %175, %177 : vector<1x256xi1>
    %cst_36 = arith.constant 0.000000e+00 : f32
    %179 = vector.broadcast %cst_36 : f32 to vector<1x256xf32>
    %180 = arith.select %178, %173, %179 : vector<1x256xi1>, vector<1x256xf32>
    %181 = vector.extract_strided_slice %46 {offsets = [0, 16], sizes = [1, 240], strides = [1, 1]} : vector<1x256xf32> to vector<1x240xf32>
    %182 = vector.extract_strided_slice %46 {offsets = [0, 0], sizes = [1, 16], strides = [1, 1]} : vector<1x256xf32> to vector<1x16xf32>
    %183 = tpu.concatenate %181, %182 in 1 : vector<1x240xf32>, vector<1x16xf32> -> vector<1x256xf32>
    %184 = vector.extract_strided_slice %49 {offsets = [0, 16], sizes = [1, 240], strides = [1, 1]} : vector<1x256xf32> to vector<1x240xf32>
    %185 = vector.extract_strided_slice %49 {offsets = [0, 0], sizes = [1, 16], strides = [1, 1]} : vector<1x256xf32> to vector<1x16xf32>
    %186 = tpu.concatenate %184, %185 in 1 : vector<1x240xf32>, vector<1x16xf32> -> vector<1x256xf32>
    %187 = vector.broadcast %62 : f32 to vector<1x256xf32>
    %188 = arith.mulf %183, %187 : vector<1x256xf32>
    %189 = vector.broadcast %71 : f32 to vector<1x256xf32>
    %190 = arith.mulf %186, %189 : vector<1x256xf32>
    %191 = arith.addf %188, %190 : vector<1x256xf32>
    %c15_i32_37 = arith.constant 15 : i32
    %192 = vector.broadcast %c15_i32_37 : i32 to vector<1x256xi32>
    %193 = arith.cmpi slt, %54, %192 : vector<1x256xi32>
    %cst_38 = arith.constant 0.000000e+00 : f32
    %194 = vector.broadcast %cst_38 : f32 to vector<1x256xf32>
    %195 = arith.select %193, %191, %194 : vector<1x256xi1>, vector<1x256xf32>
    %196 = arith.addf %180, %195 : vector<1x256xf32>
    %197 = vector.extract_strided_slice %46 {offsets = [0, 17], sizes = [1, 239], strides = [1, 1]} : vector<1x256xf32> to vector<1x239xf32>
    %198 = vector.extract_strided_slice %46 {offsets = [0, 0], sizes = [1, 17], strides = [1, 1]} : vector<1x256xf32> to vector<1x17xf32>
    %199 = tpu.concatenate %197, %198 in 1 : vector<1x239xf32>, vector<1x17xf32> -> vector<1x256xf32>
    %200 = vector.extract_strided_slice %49 {offsets = [0, 17], sizes = [1, 239], strides = [1, 1]} : vector<1x256xf32> to vector<1x239xf32>
    %201 = vector.extract_strided_slice %49 {offsets = [0, 0], sizes = [1, 17], strides = [1, 1]} : vector<1x256xf32> to vector<1x17xf32>
    %202 = tpu.concatenate %200, %201 in 1 : vector<1x239xf32>, vector<1x17xf32> -> vector<1x256xf32>
    %203 = vector.broadcast %63 : f32 to vector<1x256xf32>
    %204 = arith.mulf %199, %203 : vector<1x256xf32>
    %205 = vector.broadcast %72 : f32 to vector<1x256xf32>
    %206 = arith.mulf %202, %205 : vector<1x256xf32>
    %207 = arith.addf %204, %206 : vector<1x256xf32>
    %c15_i32_39 = arith.constant 15 : i32
    %208 = vector.broadcast %c15_i32_39 : i32 to vector<1x256xi32>
    %209 = arith.cmpi slt, %52, %208 : vector<1x256xi32>
    %c15_i32_40 = arith.constant 15 : i32
    %210 = vector.broadcast %c15_i32_40 : i32 to vector<1x256xi32>
    %211 = arith.cmpi slt, %54, %210 : vector<1x256xi32>
    %212 = arith.andi %209, %211 : vector<1x256xi1>
    %cst_41 = arith.constant 0.000000e+00 : f32
    %213 = vector.broadcast %cst_41 : f32 to vector<1x256xf32>
    %214 = arith.select %212, %207, %213 : vector<1x256xi1>, vector<1x256xf32>
    %215 = arith.addf %196, %214 : vector<1x256xf32>
    %216 = arith.addf %125, %162 : vector<1x256xf32>
    %217 = arith.addf %216, %215 : vector<1x256xf32>
    %c0_42 = arith.constant 0 : index
    %218 = memref.load %arg7[%c0_42] : memref<1xf32, #tpu.memory_space<smem>>
    %219 = vector.broadcast %218 : f32 to vector<1x256xf32>
    %220 = arith.addf %217, %219 : vector<1x256xf32>
    %221 = arith.negf %220 : vector<1x256xf32>
    %222 = math.exp %221 : vector<1x256xf32>
    %cst_43 = arith.constant 1.000000e+00 : f32
    %223 = vector.broadcast %cst_43 : f32 to vector<1x256xf32>
    %224 = arith.addf %223, %222 : vector<1x256xf32>
    %225 = arith.divf %223, %224 : vector<1x256xf32>
    %226 = vector.shape_cast %225 : vector<1x256xf32> to vector<1x1x256xf32>
    %227 = vector.broadcast %226 : vector<1x1x256xf32> to vector<1x4x256xf32>
    %228 = arith.mulf %45, %227 : vector<1x4x256xf32>
    %c0_44 = arith.constant 0 : index
    %c0_45 = arith.constant 0 : index
    %c0_46 = arith.constant 0 : index
    %229 = vector.load %arg8[%c0_44, %c0_45, %c0_46] : memref<1x4x256xf32, #tpu.memory_space<vmem>>, vector<1x4x256xf32>
    tpu.vector_store %arg8[%c0_44, %c0_45, %c0_46], %228 {strides = array<i32>} : memref<1x4x256xf32, #tpu.memory_space<vmem>>, vector<1x4x256xf32>,
    return
  }
  func.func @transform_0(%arg0: i32) -> (i32, i32, i32) {
    %c0_i32 = arith.constant 0 : i32
    %c0_i32_0 = arith.constant 0 : i32
    %c0_i32_1 = arith.constant 0 : i32
    return %arg0, %c0_i32, %c0_i32_0 : i32, i32, i32
  }
  func.func @transform_1(%arg0: i32) -> (i32, i32) {
    %c0_i32 = arith.constant 0 : i32
    %c0_i32_0 = arith.constant 0 : i32
    %c0_i32_1 = arith.constant 0 : i32
    return %c0_i32, %c0_i32_0 : i32, i32
  }
  func.func @transform_2(%arg0: i32) -> (i32, i32) {
    %c0_i32 = arith.constant 0 : i32
    %c0_i32_0 = arith.constant 0 : i32
    %c0_i32_1 = arith.constant 0 : i32
    return %c0_i32, %c0_i32_0 : i32, i32
  }
  func.func @transform_3(%arg0: i32) -> (i32, i32) {
    %c0_i32 = arith.constant 0 : i32
    %c0_i32_0 = arith.constant 0 : i32
    %c0_i32_1 = arith.constant 0 : i32
    return %c0_i32, %c0_i32_0 : i32, i32
  }
  func.func @transform_4(%arg0: i32) -> (i32, i32) {
    %c0_i32 = arith.constant 0 : i32
    %c0_i32_0 = arith.constant 0 : i32
    %c0_i32_1 = arith.constant 0 : i32
    return %c0_i32, %c0_i32_0 : i32, i32
  }
  func.func @transform_5(%arg0: i32) -> i32 {
    %c0_i32 = arith.constant 0 : i32
    %c0_i32_0 = arith.constant 0 : i32
    return %c0_i32 : i32
  }
  func.func @transform_6(%arg0: i32) -> i32 {
    %c0_i32 = arith.constant 0 : i32
    %c0_i32_0 = arith.constant 0 : i32
    return %c0_i32 : i32
  }
  func.func @transform_7(%arg0: i32) -> (i32, i32, i32) {
    %c0_i32 = arith.constant 0 : i32
    %c0_i32_0 = arith.constant 0 : i32
    %c0_i32_1 = arith.constant 0 : i32
    return %arg0, %c0_i32, %c0_i32_0 : i32, i32, i32
  }
}

</mosaic_0001>

<bundles_post_ra>
// kernel: tpu_custom_call.1
= control target key start
LH: loop header
LB: loop body
LE: loop exit
PB: predicated region body
PF: predicated region fallthrough
CT: control target
= control target key end

     0   :  { %6 = vsyncpa [#allocation3], 0  ;;  %s137_s0 = inlined_call_operand.hbm [shape: f32[8,256], index: 0, kind: input, shape index: {}]   ;;  %s138_s1 = inlined_call_operand.hbm [shape: f32[8,256], index: 1, kind: output, shape index: {}]  }
   0x1   :  { %7 = vsyncpa [#allocation4], 0  ;;  %s100_s6 = smov [#allocation2]   ;;  %s52_s10 = scalar_lea.hbm %s137_s0, 256 }
   0x2   :  { %s14_s7 = sshll.u32 %s100_s6, 4  ;;  %p53_p0 = scmp.ne.s32.totalorder %s137_s0, %s52_s10  ;;  %s15_s7 = int_to_ptr.vmem [resolvable:$true] %s14_s7 }
   0x3   :  { %p56_p1 = scmp.lt.u32.totalorder %s52_s10, %s137_s0 }
   0x5   :  { %p58_p2 = pnand %p56_p1, %p53_p0 }
   0x7   :  { %61 = shalt.err (!%p58_p2)
}
   0x8   :  { %s62_s15 = scalar_lea.vmem %s15_s7, 256  ;;  %p67_p4 = scmp.lt.s32.totalorder %s15_s7, %s15_s7 }
   0x9   :  { %p63_p3 = scmp.ne.s32.totalorder %s15_s7, %s62_s15  ;;  %p68_p5 = scmp.lt.s32.totalorder %s62_s15, %s62_s15 }
   0xb   :  { %p69_p6 = por %p68_p5, %p67_p4 }
   0xd   :  { %p70_p7 = pnand %p69_p6, %p63_p3 }
   0xf   :  { %73 = shalt.err (!%p70_p7)
}
  0x10   :  { %17 = dma.hbm_to_vmem [thread:$0]  %s137_s0, 256, %s15_s7, [#allocation3]  }
  0x11   :  { %96 = dma.done.wait [#allocation3], 256  }
  0x12   :  { %97 = vsyncadd [#allocation3], 4294967040  ;;  %v21_v0 = vld [vmem:[#allocation2] sm:$0xff]  ;;  %s101_s18 = smov 111   ;;  %v22_v1 = vld [vmem:[#allocation2 + $0x8] sm:$0xff]  ;;  %v27_v2 = vlaneseq  ;;  %s102_s19 = smov [#allocation5]  }
  0x13   :  { %23 = vrot.lane.b32.xlu0 %v21_v0, %s101_s18  ;;  %s40_s20 = sshll.u32 %s102_s19, 4  ;;  %s41_s20 = int_to_ptr.vmem [resolvable:$true] %s40_s20 }
  0x14   :  { %v28_v3 = vand.u32 127, %v27_v2  ;;  %s74_s0 = scalar_lea.vmem %s41_s20, 256  ;;  %p79_p9 = scmp.lt.s32.totalorder %s41_s20, %s41_s20 }
  0x15   :  { %p75_p8 = scmp.ne.s32.totalorder %s41_s20, %s74_s0  ;;  %p80_p10 = scmp.lt.s32.totalorder %s74_s0, %s74_s0 }
  0x16   :  { %vm29_vm0 = vcmp.lt.s32.totalorder %v28_v3, 111 }
  0x17   :  { %25 = vrot.lane.b32.xlu0 %v22_v1, %s101_s18  ;;  %p81_p11 = por %p80_p10, %p79_p9 }
  0x19   :  { %p82_p12 = pnand %p81_p11, %p75_p8 }
  0x85   :  { %v24_v4 = vpop.permute.xlu0 %23 }
  0x89   :  { %v26_v5 = vpop.permute.xlu0 %25 }
  0x8a   :  { %v30_v6 = vsel %vm29_vm0, %v24_v4, %v26_v5  ;;  %v31_v7 = vsel %vm29_vm0, %v26_v5, %v24_v4 }
  0x8b   :  { %32 = vst [vmem:[#allocation5] sm:$0xff] %v30_v6  ;;  %33 = vst [vmem:[#allocation5 + $0x8] sm:$0xff] %v31_v7 }
  0x8c   :  { %85 = shalt.err (!%p82_p12)
}
  0x8d   :  { %s86_s23 = scalar_lea.hbm %s138_s1, 256 }
  0x8e   :  { %p87_p13 = scmp.ne.s32.totalorder %s138_s1, %s86_s23  ;;  %p90_p0 = scmp.lt.u32.totalorder %s86_s23, %s138_s1 }
  0x90   :  { %p92_p1 = pnand %p90_p0, %p87_p13 }
  0x92   :  { %95 = shalt.err (!%p92_p1)
}
  0x93   :  { %43 = dma.vmem_to_hbm [thread:$0]  %s41_s20, 256, %s138_s1, [#allocation4]  }
  0x94   :  { %98 = dma.done.wait [#allocation4], 256  }
  0x95   :  { %99 = vsyncadd [#allocation4], 4294967040 }
  0x96   :  { %47 = vsyncpa [#allocation3], 1 }
  0x97   :  { %48 = vsyncpa [#allocation4], 1 }

// kernel: tpu_custom_call.1
= control target key start
LH: loop header
LB: loop body
LE: loop exit
PB: predicated region body
PF: predicated region fallthrough
CT: control target
= control target key end

     0   :  { %s1948_s0 = inlined_call_operand.hbm [shape: f32[2,4,256], index: 0, kind: input, shape index: {}]   ;;  %s1949_s1 = inlined_call_operand.vmem [shape: f32[2,4], index: 1, kind: input, shape index: {}]   ;;  %s1950_s2 = inlined_call_operand.vmem [shape: f32[1,2], index: 2, kind: input, shape index: {}]   ;;  %s1951_s3 = inlined_call_operand.vmem [shape: f32[4,2], index: 3, kind: input, shape index: {}]   ;;  %s1952_s4 = inlined_call_operand.vmem [shape: f32[1,4], index: 4, kind: input, shape index: {}]   ;;  %s1953_s5 = inlined_call_operand.vmem [shape: f32[18], index: 5, kind: input, shape index: {}]   ;;  %s1954_s6 = inlined_call_operand.<no memory space> [shape: f32[1], index: 6, kind: input, shape index: {}]   ;;  %s1955_s7 = inlined_call_operand.hbm [shape: f32[2,4,256], index: 7, kind: output, shape index: {}]  }
   0x1   :  { %1960 = sst [smem:[#allocation12_spill]] %s1948_s0 }
   0x2   :  { %1961 = sst [smem:[#allocation13_spill]] %s1949_s1 }
   0x3   :  { %12 = sst [smem:[#allocation2]] %s1954_s6 }
   0x4   :  { %13 = vsyncpa [#allocation4], 0 }
   0x5   :  { %15 = vsyncpa [#allocation4 + $0x1], 0 }
   0x6   :  { %16 = vsyncpa [#allocation6], 0 }
   0x7   :  { %17 = vsyncpa [#allocation5], 0 }
   0x8   :  { %19 = vsyncpa [#allocation5 + $0x1], 0  ;;  %s1319_s26 = smov 0   ;;  %s1321_s27 = smov 0  }
   0x9   :  { %s1323_s28 = smov 0   ;;  %s1325_s29 = smov 0  }
   0xa LB: > { %s1340_s6 = sadd.s32 4294967295, %s1261_s29   ;;  %s1024_s30 = sadd.s32 4294967294, %s1261_s29   ;;  %s1261_s29 = sphi %s1325_s29, %s1998_s29   ;;  %s1257_s28 = sphi %s1323_s28, %s1997_s28   ;;  %s1253_s27 = sphi %s1321_s27, %s1996_s27   ;;  %s1249_s26 = sphi %s1319_s26, %s1995_s26  }
   0xb   : > { %p45_p0 = scmp.ne.s32.totalorder %s1253_s27, %s1249_s26  ;;  %p1956_p1 = scmp.eq.s32.totalorder %s1340_s6, 0 }
   0xc   : > { %p201_p3 = scmp.eq.s32.totalorder %s1024_s30, 1  ;;  %p1025_p5 = scmp.ge.s32.totalorder %s1261_s29, 1 }
   0xd   : > { %p1349_p4 = por %p1956_p1, %p45_p0  ;;  %p208_p7 = scmp.lt.s32.totalorder %s1261_s29, 3 }
   0xe   : > { %p1354_p6 = por %p201_p3, %p45_p0  ;;  %s233_s12 = sshll.u32 %s1953_s5, 4  ;;  %s234_s12 = int_to_ptr.vmem [resolvable:$true] %s233_s12 }
   0xf   : > { %s1962_s8 = scalar_select %p1349_p4, 1, 0 }
  0x10   : > { %s1963_s9 = scalar_select %p1354_p6, 1, 0 }
  0x11   : > { %p1362_p8 = pnand %p1025_p5, %p208_p7  ;;  %s1370_s14 = sadd.s32 1, %s1261_s29  }
  0x12   : > { %s29_s16 = ssub.s32 %s1261_s29, %s1370_s14  ;;  %s32_s18 = sadd.s32 1, %s1257_s28 }
  0x13   : > { %p1072_p10 = pneg %p1362_p8  ;;  %p1380_p12 = scmp.eq.s32.totalorder %s29_s16, 0 }
  0x14   : > { %p39_p13 = scmp.ne.s32.totalorder %s1257_s28, %s1253_s27  ;;  %s1146_s19 = scalar_lea.vmem %s234_s12, 16 }
  0x15   : > { %p1374_p11 = pnand %p1072_p10, %p1956_p1  ;;  %p1147_p0 = scmp.ne.s32.totalorder %s234_s12, %s1146_s19 }
  0x16   : > { %p1154_p9 = scmp.lt.s32.totalorder %s234_s12, %s234_s12  ;;  %p1155_p2 = scmp.lt.s32.totalorder %s1146_s19, %s1146_s19 }
  0x17   : > { %p1148_p3 = pneg %p1374_p11 }
  0x18   : > { %p1156_p10 = por %p1155_p2, %p1154_p9 }
  0x19   : > { %p1149_p5 = pnand %p1148_p3, %p1147_p0 }
  0x1b   : > { %p1150_p7 = pneg %p1149_p5 }
  0x1d   : > { %p1157_p1 = pnand %p1156_p10, %p1150_p7 }
  0x1f   : > { %1160 = shalt.err (!%p1157_p1)
}
  0x20   : > { %s1263_s20 = smov [#allocation7]   ;;  %p40_p2 = scmp.eq.s32.totalorder %s1261_s29, 0 }
  0x21   : > { %1075 = dma.vmem_to_smem (!%p1374_p11), %s234_s12, 16, %s1263_s20, [#allocation6]  }
  0x22   : > { %s1394_s21 = scalar_select %p1380_p12, %s1257_s28, %s32_s18  }
  0x23   : > { %p1967_p1 = scmp.eq.s32.totalorder %s1340_s6, 1  ;;  %p1085_p0 = scmp.lt.s32.totalorder %s1261_s29, 2 }
  0x24   : > { %s247_s23 = sand.u32 1, %s1257_s28   ;;  %p41_p3 = por %p40_p2, %p39_p13 }
  0x25   : > { %p1402_p9 = por %p1967_p1, %p39_p13  ;;  %s1028_s24 = sshll.u32 %s247_s23, 3 }
  0x26   : > { %s1062_s25 = sshll.u32 %s1261_s29, 7  ;;  %s1969_s0 = sld [smem:[#allocation12_spill]] }
  0x27   : > { %s1968_s22 = scalar_select %p1402_p9, 1, 0 }
  0x28   : > { %s251_s12 = scalar_lea.vmem [#allocation3], %s1028_s24  ;;  %p1417_p11 = pnand %p1085_p0, %p41_p3 }
  0x29   : > { %s259_s15 = sshll.u32 %s251_s12, 4  ;;  %s248_s17 = scalar_lea.sflag [#allocation4], %s247_s23  ;;  %s1421_s15 = int_to_ptr.vmem [resolvable:$true] %s259_s15 }
  0x2a   : > { %p1163_p13 = pneg %p1417_p11 }
  0x2c   : > { %s1415_s11 = scalar_lea.hbm %s1969_s0, %s1062_s25  ;;  %s1166_s24 = scalar_lea.hbm %s1969_s0, 256 }
  0x2d   : > { %s1161_s18 = scalar_lea.hbm %s1415_s11, 128  ;;  %p1167_p10 = scmp.lt.u32.totalorder %s1415_s11, %s1969_s0 }
  0x2e   : > { %p1162_p12 = scmp.ne.s32.totalorder %s1415_s11, %s1161_s18  ;;  %p1168_p2 = scmp.lt.u32.totalorder %s1166_s24, %s1161_s18 }
  0x2f   : > { %p1170_p0 = scmp.lt.u32.totalorder %s1161_s18, %s1415_s11 }
  0x30   : > { %p1164_p5 = pnand %p1163_p13, %p1162_p12  ;;  %p1169_p1 = por %p1168_p2, %p1167_p10 }
  0x32   : > { %p1165_p7 = pneg %p1164_p5  ;;  %p1171_p3 = por %p1170_p0, %p1169_p1 }
  0x34   : > { %p1172_p6 = pnand %p1171_p3, %p1165_p7 }
  0x36   : > { %1175 = shalt.err (!%p1172_p6)
}
  0x37   : > { %s1176_s23 = scalar_lea.vmem %s1421_s15, 128  ;;  %s1264_s10 = smov [#allocation3]  }
  0x38   : > { %p1177_p12 = scmp.ne.s32.totalorder %s1421_s15, %s1176_s23  ;;  %s1181_s12 = sshll.u32 %s1264_s10, 4  ;;  %s1182_s12 = int_to_ptr.vmem [resolvable:$false] %s1181_s12 }
  0x39   : > { %s1183_s19 = scalar_lea.vmem %s1182_s12, 256  ;;  %p1184_p4 = scmp.lt.s32.totalorder %s1421_s15, %s1182_s12 }
  0x3a   : > { %p1179_p5 = pnand %p1177_p12, %p1163_p13  ;;  %p1185_p10 = scmp.lt.s32.totalorder %s1183_s19, %s1176_s23 }
  0x3c   : > { %p1180_p9 = pneg %p1179_p5  ;;  %p1186_p2 = por %p1185_p10, %p1184_p4 }
  0x3e   : > { %p1187_p1 = pnand %p1186_p2, %p1180_p9 }
  0x40   : > { %1190 = shalt.err (!%p1187_p1)
}
  0x41   : > { %1079 = dma.hbm_to_vmem [thread:$0]  (!%p1417_p11), %s1415_s11, 128, %s1421_s15, %s248_s17  }
  0x42   : > { %268 = sbr.rel (%p1362_p8) target bundleno = 1226 (0x4ca), region = 48  ;;  %s1451_s18 = sand.u32 (!%p1362_p8), 1, %s1253_s27  }
  0x43   : > { %s1959_s20 = sshll.u32 (!%p1362_p8), %s1451_s18, 3  ;;  %s271_s24 = scalar_lea.sflag (!%p1362_p8), [#allocation4], %s1451_s18 }
  0x44   : > { %s274_s25 = scalar_lea.vmem (!%p1362_p8), [#allocation3], %s1959_s20  ;;  %p1971_p4 = scmp.ne.s32.totalorder (!%p1362_p8), %s1962_s8, 0 }
  0x49   : > { %1236 = dma.done.wait (%p1971_p4), %s271_s24, 128  }
  0x4a   : > { %1238 = vsyncadd (%p1971_p4), %s271_s24, 4294967168  ;;  %p1972_p6 = scmp.eq.s32.totalorder %s1340_s6, 0 }
  0x4c   : > { %1240 = dma.done.wait (%p1972_p6), [#allocation6], 16   ;;  %p1973_p8 = pmov %p1972_p6 }
  0x4e   : > { %1242 = vsyncadd (%p1973_p8), [#allocation6], 4294967280 }
  0x4f   : > { %283 = sfence }
  0x50   : > { %v1465_v0 = vld [vmem:[%s274_s25] sm:$0xff]  ;;  %vm314_vm0 = vcmask 1043456   ;;  %v332_v1 = vlaneseq  ;;  %s1974_s1 = sld [smem:[#allocation13_spill]]  ;;  %v1265_v15 = vmov 0   ;;  %vm368_vm1 = vcmask 1041409   ;;  %s1537_s10 = sld [smem:[#allocation7 + $0x4]] }
  0x51   : > { %v312_v2 = vcombine.high %v1465_v0, %v1465_v0  ;;  %v315_v3 = vsel %vm314_vm0, %v1465_v0, 0.0  ;;  %v322_v6 = vsel %vm314_vm0, %v1465_v0, -inf  ;;  %1131 = vset.pattern.permute.xlu0 %v1265_v15  ;;  %1132 = vset.pattern.permute.xlu1 %v1265_v15  ;;  %v1035_v25 = vld [vmem:[%s1950_s2] ss:$0 sm:$0xff]  ;;  %vm371_vm2 = vcmask 25600   ;;  %s1539_s12 = sld [smem:[#allocation7 + $0xd]] }
  0x52   : > { %v1471_v4 = vshrl.u32 %v332_v1, 7  ;;  %v329_v26 = vld [vmem:[%s1951_s3] sm:$0xf]  ;;  %v1492_v29 = vand.u32 127, %v332_v1  ;;  %vm456_vm3 = vcmask 1042434   ;;  %vm458_vm4 = vcmask 1043459  }
  0x53   : > { %v316_v5 = vsel %vm314_vm0, %v312_v2, 0.0  ;;  %v323_v7 = vsel %vm314_vm0, %v312_v2, -inf  ;;  %vm461_vm5 = vcmask 11264   ;;  %s1267_s19 = smov 1   ;;  %s1268_s24 = smov 17   ;;  %vm731_vm6 = vcmask 7168  }
  0x54   : > { %v317_v9 = vadd.f32 %v316_v5, %v315_v3  ;;  %v1481_v10 = vsub.s32 0, %v1471_v4  ;;  %v341_v11 = vsub.s32 1, %v1471_v4  ;;  %v324_v12 = vmax.f32 %v322_v6, %v323_v7  ;;  %s1269_s25 = smov 127   ;;  %s1270_s8 = smov 16  }
  0x55   : > { %v1496_v31 = vsub.s32 %v1492_v29, %v1471_v4  ;;  %v403_v43 = vsub.s32 2, %v1471_v4  ;;  %v410_v45 = vsub.s32 3, %v1471_v4  ;;  %s1271_s13 = smov 113   ;;  %s1272_s11 = smov 15   ;;  %vm628_vm7 = vcmask 138240  }
  0x56   : > { %v327_v8 = vld [vmem:[%s1974_s1] sm:$0x3]  ;;  %318 = vadd.xlane.f32.xlu0 %v317_v9  ;;  %v390_v27 = vrot.slane %v329_v26, %v1481_v10  ;;  %v397_v28 = vrot.slane %v329_v26, %v341_v11  ;;  %s1273_s15 = smov 112   ;;  %s1274_s16 = smov 111   ;;  %vm665_vm8 = vcmask 130048   ;;  %vm769_vm9 = vcmask 1039360  }
  0x57   : > { %v335_v13 = vrot.slane %v327_v8, %v1481_v10  ;;  %v342_v14 = vrot.slane %v327_v8, %v341_v11  ;;  %v404_v44 = vrot.slane %v329_v26, %v403_v43  ;;  %v411_v46 = vrot.slane %v329_v26, %v410_v45  ;;  %s1585_s17 = sld [smem:[#allocation7 + $0x3]]  ;;  %s1587_s30 = sld [smem:[#allocation7]] }
  0x58   : > { %s1589_s23 = sld [smem:[#allocation7 + $0x1]]  ;;  %s1620_s20 = sld [smem:[#allocation7 + $0x10]]  ;;  %vm696_vm10 = vcmask 121856   ;;  %vm800_vm11 = vcmask 924672   ;;  %vm833_vm12 = vcmask 916480   ;;  %vm864_vm13 = vcmask 908288  }
  0x59   : > { %337 = vbcast.lane.b32.xlu1 %v335_v13, 256  ;;  %s1622_s0 = sld [smem:[#allocation7 + $0xb]]  ;;  %s1624_s1 = sld [smem:[#allocation7 + $0x11]] }
  0x5a   : > { %325 = vmax.xlane.f32.xlu0 %v324_v12  ;;  %p1992_p11 = scmp.ne.s32.totalorder %s1968_s22, 0 }
  0x5d   : > { %344 = vbcast.lane.b32.xlu1 %v342_v14, 256 }
  0xcb   : > { %v338_v16 = vpop.permute.xlu1 %337 }
  0xcf   : > { %v345_v22 = vpop.permute.xlu1 %344 }
  0xe3   : > { %v319_v17 = vpop.xlane.xlu0 %318 }
  0xe4   : > { %v321_v18 = vmul.f32 0.00390625, %v319_v17 }
  0xe6   : > { %v348_v19 = vmul.f32 %v338_v16, %v321_v18  ;;  %v349_v23 = vmul.f32 %v345_v22, %v321_v18 }
  0xe7   : > { %v326_v20 = vpop.xlane.xlu0 %325 }
  0xe8   : > { %v475_v21 = vmul.f32 %v338_v16, %v326_v20  ;;  %353 = vperm.xlu0 %1131, %v348_v19   ;;  %v476_v24 = vmul.f32 %v345_v22, %v326_v20 }
  0xea   : > { %480 = vperm.xlu1 %1132, %v475_v21  }
  0xee   : > { %356 = vperm.xlu1 %1132, %v349_v23  }
  0xf2   : > { %483 = vperm.xlu1 %1132, %v476_v24  }
  0xf6   : > { %381 = vbcast.lane.b32.xlu1 %v1035_v25, 256 }
  0xfa   : > { %392 = vbcast.lane.b32.xlu1 %v390_v27, 256 }
  0xfe   : > { %399 = vbcast.lane.b32.xlu1 %v397_v28, 256 }
 0x167   : > { %v354_v32 = vpop.permute.xlu0 %353 }
 0x168   : > { %v363_v34 = vrot.slane %v354_v32, %v1496_v31 }
 0x169   : > { %v481_v30 = vpop.permute.xlu1 %480 }
 0x16a   : > { %v488_v39 = vrot.slane %v481_v30, %v1496_v31  ;;  %v1036_v30 = vld [vmem:[%s1952_s4] ss:$0 sm:$0xff] }
 0x16d   : > { %v357_v33 = vpop.permute.xlu1 %356 }
 0x16e   : > { %v367_v35 = vrot.slane %v357_v33, %v1496_v31 }
 0x170   : > { %v369_v36 = vsel %vm368_vm1, %v367_v35, %v363_v34 }
 0x171   : > { %v484_v37 = vpop.permute.xlu1 %483  ;;  %v372_v38 = vsel %vm371_vm2, %v369_v36, 0.0 }
 0x172   : > { %v492_v40 = vrot.slane %v484_v37, %v1496_v31  ;;  %373 = vadd.xlane.f32.xlu1 %v372_v38 }
 0x174   : > { %v493_v41 = vsel %vm368_vm1, %v492_v40, %v488_v39 }
 0x175   : > { %v495_v42 = vsel %vm371_vm2, %v493_v41, 0.0  ;;  %v382_v47 = vpop.permute.xlu1 %381  ;;  %v1266_v41 = vmov 839922192  }
 0x176   : > { %496 = vadd.xlane.f32.xlu0 %v495_v42  ;;  %v556_v42 = vunpack.c.l.s4 %v1266_v41 }
 0x178   : > { %v557_v43 = vunpack.c.0.s8 %v556_v42 }
 0x179   : > { %v393_v48 = vpop.permute.xlu1 %392 }
 0x17d   : > { %v400_v49 = vpop.permute.xlu1 %399 }
 0x183   : > { %406 = vbcast.lane.b32.xlu1 %v404_v44, 256  ;;  %v560_v44 = vsub.s32 %v557_v43, %v1471_v4  ;;  %v1616_v43 = vadd.s32 128, %v1492_v29 }
 0x18c   : > { %413 = vbcast.lane.b32.xlu0 %v411_v46, 256 }
 0x1ff   : > { %v374_v50 = vpop.xlane.xlu1 %373 }
 0x200   : > { %v384_v55 = vadd.f32 %v382_v47, %v374_v50 }
 0x202   : > { %v385_v59 = vmax.f32 %v384_v55, 0.0 }
 0x203   : > { %v497_v51 = vpop.xlane.xlu0 %496  ;;  %v407_v54 = vpop.permute.xlu1 %406 }
 0x204   : > { %v498_v52 = vadd.f32 %v497_v51, %v382_v47  ;;  %v419_v62 = vmul.f32 %v393_v48, %v385_v59  ;;  %v420_v63 = vmul.f32 %v400_v49, %v385_v59  ;;  %v421_v1 = vmul.f32 %v407_v54, %v385_v59 }
 0x206   : > { %v499_v53 = vmax.f32 %v498_v52, 0.0 }
 0x207   : > { %v414_v58 = vpop.permute.xlu0 %413 }
 0x208   : > { %v502_v56 = vmul.f32 %v499_v53, %v407_v54  ;;  %v500_v57 = vmul.f32 %v499_v53, %v393_v48  ;;  %v503_v60 = vmul.f32 %v499_v53, %v414_v58  ;;  %v501_v61 = vmul.f32 %v499_v53, %v400_v49 }
 0x209   : > { %v422_v2 = vmul.f32 %v414_v58, %v385_v59 }
 0x20a   : > { %515 = vperm.xlu0 %1131, %v502_v56   ;;  %509 = vperm.xlu1 %1132, %v500_v57  }
 0x20e   : > { %512 = vperm.xlu1 %1132, %v501_v61   ;;  %518 = vperm.xlu0 %1131, %v503_v60  }
 0x212   : > { %428 = vperm.xlu1 %1132, %v419_v62  }
 0x216   : > { %431 = vperm.xlu1 %1132, %v420_v63  }
 0x21a   : > { %434 = vperm.xlu1 %1132, %v421_v1  }
 0x21e   : > { %437 = vperm.xlu1 %1132, %v422_v2  }
 0x289   : > { %v510_v3 = vpop.permute.xlu1 %509  ;;  %v516_v5 = vpop.permute.xlu0 %515 }
 0x28a   : > { %v523_v8 = vrot.slane %v510_v3, %v1496_v31  ;;  %v531_v11 = vrot.slane %v516_v5, %v1496_v31 }
 0x28d   : > { %v513_v6 = vpop.permute.xlu1 %512  ;;  %v519_v7 = vpop.permute.xlu0 %518 }
 0x28e   : > { %v527_v9 = vrot.slane %v513_v6, %v1496_v31  ;;  %v535_v13 = vrot.slane %v519_v7, %v1496_v31 }
 0x290   : > { %v536_v12 = vsel %vm368_vm1, %v527_v9, %v523_v8 }
 0x291   : > { %v429_v14 = vpop.permute.xlu1 %428  ;;  %v537_v15 = vsel %vm456_vm3, %v531_v11, %v536_v12  ;;  %v755_v12 = vstv %s1537_s10  ;;  %s1591_s10 = sld [smem:[#allocation7 + $0x5]] }
 0x292   : > { %v538_v16 = vsel %vm458_vm4, %v535_v13, %v537_v15  ;;  %v442_v22 = vrot.slane %v429_v14, %v1496_v31  ;;  %v758_v13 = vstv %s1539_s12  ;;  %s1597_s12 = sld [smem:[#allocation7 + $0x2]] }
 0x293   : > { %v540_v17 = vsel %vm461_vm5, %v538_v16, 0.0 }
 0x294   : > { %541 = vadd.xlane.f32.xlu0 %v540_v17 }
 0x295   : > { %v432_v18 = vpop.permute.xlu1 %431 }
 0x296   : > { %v446_v20 = vrot.slane %v432_v18, %v1496_v31 }
 0x298   : > { %v455_v24 = vsel %vm368_vm1, %v446_v20, %v442_v22 }
 0x299   : > { %v435_v19 = vpop.permute.xlu1 %434 }
 0x29a   : > { %v450_v21 = vrot.slane %v435_v19, %v1496_v31 }
 0x29c   : > { %v457_v26 = vsel %vm456_vm3, %v450_v21, %v455_v24 }
 0x29d   : > { %v438_v23 = vpop.permute.xlu1 %437 }
 0x29e   : > { %v454_v25 = vrot.slane %v438_v23, %v1496_v31 }
 0x2a0   : > { %v459_v27 = vsel %vm458_vm4, %v454_v25, %v457_v26 }
 0x2a1   : > { %v462_v28 = vsel %vm461_vm5, %v459_v27, 0.0 }
 0x2a2   : > { %463 = vadd.xlane.f32.xlu1 %v462_v28 }
 0x2aa   : > { %471 = vbcast.lane.b32.xlu0 %v1036_v30, 256 }
 0x321   : > { %v542_v32 = vpop.xlane.xlu0 %541 }
 0x325   : > { %v472_v33 = vpop.permute.xlu0 %471 }
 0x326   : > { %v543_v35 = vadd.f32 %v542_v32, %v472_v33 }
 0x32f   : > { %v464_v34 = vpop.xlane.xlu1 %463 }
 0x330   : > { %v474_v36 = vadd.f32 %v472_v33, %v464_v34 }
 0x332   : > { %v544_v37 = vadd.f32 %v543_v35, %v474_v36 }
 0x334   : > { %v1037_v38 = vmul.f32 -1.442695, %v544_v37 }
 0x336   : > { %1134 = vpow2.f32 %v1037_v38 }
 0x340   : > { %v1135_v31 = vpop.eup %1134 }
 0x341   : > { %v548_v39 = vadd.f32 1.0, %v1135_v31 }
 0x343   : > { %1136 = vrcp.f32 %v548_v39 }
 0x34d   : > { %v1137_v40 = vpop.eup %1136 }
 0x34e   : > { %553 = vperm.xlu1 %1132, %v1137_v40  }
 0x3cd   : > { %v554_v45 = vpop.permute.xlu1 %553 }
 0x3ce   : > { %v561_v46 = vrot.slane %v554_v45, %v560_v44  ;;  %v745_v44 = vstv %s1585_s17  ;;  %v644_v45 = vstv %s1587_s30 }
 0x3d0   : > { %v1527_v47 = vmul.f32 %v561_v46, %v1465_v0  ;;  %v679_v46 = vstv %s1589_s23 }
 0x3d2   : > { %v565_v48 = vcombine.high %v1527_v47, %v1527_v47  ;;  %v567_v49 = vsel %vm314_vm0, %v1527_v47, -inf  ;;  %v581_v50 = vsel %vm314_vm0, %v1527_v47, 0.0 }
 0x3d3   : > { %v568_v51 = vrot.slane %v567_v49, 4  ;;  %v582_v52 = vrot.slane %v581_v50, 4 }
 0x3d4   : > { %v574_v53 = vsel %vm314_vm0, %v565_v48, -inf  ;;  %v588_v4 = vsel %vm314_vm0, %v565_v48, 0.0 }
 0x3d5   : > { %v569_v54 = vmax.f32 %v567_v49, %v568_v51  ;;  %v575_v55 = vrot.slane %v574_v53, 4  ;;  %v583_v56 = vadd.f32 %v582_v52, %v581_v50  ;;  %v589_v0 = vrot.slane %v588_v4, 4 }
 0x3d6   : > { %v599_v50 = vand.u32 15, %v1492_v29  ;;  %v600_v51 = vand.u32 15, %v1616_v43  ;;  %v784_v52 = vstv %s1591_s10 }
 0x3d7   : > { %v570_v57 = vrot.slane %v569_v54, 2  ;;  %v576_v58 = vmax.f32 %v574_v53, %v575_v55  ;;  %v584_v59 = vrot.slane %v583_v56, 2  ;;  %v590_v60 = vadd.f32 %v589_v0, %v588_v4 }
 0x3d8   : > { %v710_v53 = vstv %s1597_s12  ;;  %vm1654_vm14 = vcmp.ge.s32.totalorder %v599_v50, 1  ;;  %vm1660_vm15 = vcmp.ge.s32.totalorder %v600_v51, 1  ;;  %vm1742_vm4 = vcmp.lt.s32.totalorder %v599_v50, 15 }
 0x3d9   : > { %v571_v61 = vmax.f32 %v569_v54, %v570_v57  ;;  %v577_v62 = vrot.slane %v576_v58, 2  ;;  %v585_v63 = vadd.f32 %v584_v59, %v583_v56  ;;  %v591_v1 = vrot.slane %v590_v60, 2 }
 0x3da   : > { %vm1748_vm5 = vcmp.lt.s32.totalorder %v600_v51, 15 }
 0x3db   : > { %v572_v2 = vrot.slane %v571_v61, 1  ;;  %v578_v3 = vmax.f32 %v576_v58, %v577_v62  ;;  %v586_v5 = vrot.slane %v585_v63, 1  ;;  %v592_v6 = vadd.f32 %v591_v1, %v590_v60 }
 0x3dd   : > { %v573_v7 = vmax.f32 %v571_v61, %v572_v2  ;;  %v579_v8 = vrot.slane %v578_v3, 1  ;;  %v587_v9 = vadd.f32 %v586_v5, %v585_v63  ;;  %v593_v11 = vrot.slane %v592_v6, 1 }
 0x3de   : > { %v601_v61 = vshra.s32 %v1492_v29, 4  ;;  %v602_v5 = vshra.s32 %v1616_v43, 4 }
 0x3df   : > { %v580_v14 = vmax.f32 %v578_v3, %v579_v8  ;;  %v594_v15 = vadd.f32 %v593_v11, %v592_v6  ;;  %v596_v16 = vmul.f32 0.25, %v587_v9  ;;  %729 = vrot.lane.b32.xlu1 %v573_v7, %s1267_s19  ;;  %626 = vrot.lane.b32.xlu0 %v573_v7, %s1268_s24  ;;  %v756_v18 = vmul.f32 %v755_v12, %v573_v7 }
 0x3e0   : > { %v851_v8 = vstv %s1620_s20  ;;  %v713_v9 = vstv %s1622_s0  ;;  %v882_v11 = vstv %s1624_s1  ;;  %vm1696_vm0 = vcmp.ge.s32.totalorder %v601_v61, 1  ;;  %s1852_s0 = sld [smem:[#allocation2]]  ;;  %s1063_s1 = sshll.u32 %s1340_s6, 7 }
 0x3e1   : > { %v597_v17 = vmul.f32 0.25, %v594_v15  ;;  %v759_v19 = vmul.f32 %v758_v13, %v596_v16  ;;  %v757_v22 = vmul.f32 %v755_v12, %v580_v14  ;;  %vm1706_vm1 = vcmp.ge.s32.totalorder %v602_v5, 1  ;;  %s1991_s20 = sshll.u32 %s1451_s18, 3  ;;  %s1904_s12 = scalar_lea.hbm %s1955_s7, %s1063_s1 }
 0x3e2   : > { %vm1714_vm2 = vcmp.lt.s32.totalorder %v601_v61, 15  ;;  %vm1726_vm3 = vcmp.lt.s32.totalorder %v602_v5, 15  ;;  %s309_s17 = scalar_lea.vmem [#allocation8], %s1991_s20  ;;  %s1275_s6 = smov [#allocation8]  }
 0x3e3   : > { %765 = vrot.lane.b32.xlu1 %v573_v7, %s1269_s25  ;;  %663 = vrot.lane.b32.xlu0 %v573_v7, %s1270_s8  ;;  %v760_v20 = vmul.f32 %v758_v13, %v597_v17  ;;  %v1547_v21 = vadd.f32 %v759_v19, %v756_v18  ;;  %s942_s30 = sshll.u32 %s309_s17, 4  ;;  %s1906_s30 = int_to_ptr.vmem [resolvable:$true] %s942_s30 }
 0x3e5   : > { %v1549_v23 = vadd.f32 %v760_v20, %v757_v22 }
 0x3e7   : > { %796 = vrot.lane.b32.xlu1 %v573_v7, %s1271_s13  ;;  %694 = vrot.lane.b32.xlu0 %v573_v7, %s1272_s11 }
 0x3eb   : > { %829 = vrot.lane.b32.xlu1 %v573_v7, %s1273_s15  ;;  %638 = vrot.lane.b32.xlu0 %v596_v16, %s1268_s24 }
 0x3ef   : > { %860 = vrot.lane.b32.xlu1 %v573_v7, %s1274_s16  ;;  %673 = vrot.lane.b32.xlu0 %v596_v16, %s1270_s8 }
 0x3f3   : > { %726 = vrot.lane.b32.xlu0 %v580_v14, %s1267_s19  ;;  %622 = vrot.lane.b32.xlu1 %v580_v14, %s1268_s24 }
 0x3f7   : > { %704 = vrot.lane.b32.xlu0 %v596_v16, %s1272_s11  ;;  %660 = vrot.lane.b32.xlu1 %v580_v14, %s1270_s8 }
 0x3fb   : > { %767 = vrot.lane.b32.xlu0 %v580_v14, %s1269_s25  ;;  %691 = vrot.lane.b32.xlu1 %v580_v14, %s1272_s11 }
 0x3ff   : > { %798 = vrot.lane.b32.xlu0 %v580_v14, %s1271_s13  ;;  %739 = vrot.lane.b32.xlu1 %v596_v16, %s1267_s19 }
 0x403   : > { %831 = vrot.lane.b32.xlu0 %v580_v14, %s1273_s15  ;;  %775 = vrot.lane.b32.xlu1 %v596_v16, %s1269_s25 }
 0x407   : > { %862 = vrot.lane.b32.xlu0 %v580_v14, %s1274_s16  ;;  %806 = vrot.lane.b32.xlu1 %v596_v16, %s1271_s13 }
 0x40b   : > { %736 = vrot.lane.b32.xlu0 %v597_v17, %s1267_s19  ;;  %839 = vrot.lane.b32.xlu1 %v596_v16, %s1273_s15  ;;  %s1599_s19 = sld [smem:[#allocation7 + $0x6]] }
 0x40f   : > { %777 = vrot.lane.b32.xlu0 %v597_v17, %s1269_s25  ;;  %634 = vrot.lane.b32.xlu1 %v597_v17, %s1268_s24  ;;  %s1601_s24 = sld [smem:[#allocation7 + $0x7]]  ;;  %s1603_s25 = sld [smem:[#allocation7 + $0x8]] }
 0x411   : > { %v815_v4 = vstv %s1599_s19  ;;  %s928_s19 = scalar_lea.sflag [#allocation5], %s1451_s18 }
 0x413   : > { %808 = vrot.lane.b32.xlu0 %v597_v17, %s1271_s13  ;;  %670 = vrot.lane.b32.xlu1 %v597_v17, %s1270_s8  ;;  %s1605_s8 = sld [smem:[#allocation7 + $0xc]]  ;;  %s1607_s13 = sld [smem:[#allocation7 + $0xe]] }
 0x415   : > { %v848_v54 = vstv %s1601_s24  ;;  %v879_v55 = vstv %s1603_s25  ;;  %s1191_s24 = scalar_lea.vmem %s1906_s30, 128  ;;  %s1195_s25 = sshll.u32 %s1275_s6, 4  ;;  %s1196_s25 = int_to_ptr.vmem [resolvable:$false] %s1195_s25 }
 0x416   : > { %p1192_p9 = scmp.ne.s32.totalorder %s1906_s30, %s1191_s24  ;;  %p1198_p0 = scmp.lt.s32.totalorder %s1906_s30, %s1196_s25 }
 0x417   : > { %841 = vrot.lane.b32.xlu0 %v597_v17, %s1273_s15  ;;  %701 = vrot.lane.b32.xlu1 %v597_v17, %s1272_s11  ;;  %s1611_s11 = sld [smem:[#allocation7 + $0x9]]  ;;  %s1613_s15 = sld [smem:[#allocation7 + $0xf]] }
 0x418   : > { %p1193_p13 = pnand %p1192_p9, %p1992_p11 }
 0x419   : > { %v748_v56 = vstv %s1605_s8  ;;  %v787_v0 = vstv %s1607_s13  ;;  %s1197_s8 = scalar_lea.vmem %s1196_s25, 256 }
 0x41a   : > { %p1194_p7 = pneg %p1193_p13  ;;  %p1199_p3 = scmp.lt.s32.totalorder %s1197_s8, %s1191_s24 }
 0x41b   : > { %872 = vrot.lane.b32.xlu0 %v597_v17, %s1274_s16  ;;  %870 = vrot.lane.b32.xlu1 %v596_v16, %s1274_s16  ;;  %s1618_s16 = sld [smem:[#allocation7 + $0xa]] }
 0x41c   : > { %p1200_p12 = por %p1199_p3, %p1198_p0 }
 0x41d   : > { %v647_v62 = vstv %s1611_s11  ;;  %v818_v6 = vstv %s1613_s15 }
 0x41e   : > { %p1201_p5 = pnand %p1200_p12, %p1194_p7 }
 0x421   : > { %v682_v7 = vstv %s1618_s16 }
 0x451   : > { %v730_v24 = vpop.permute.xlu1 %729  ;;  %v1563_v25 = vpop.permute.xlu0 %626 }
 0x455   : > { %v1565_v26 = vpop.permute.xlu1 %765  ;;  %v1567_v27 = vpop.permute.xlu0 %663 }
 0x459   : > { %v1569_v28 = vpop.permute.xlu1 %796  ;;  %v1571_v30 = vpop.permute.xlu0 %694 }
 0x45d   : > { %v1573_v32 = vpop.permute.xlu1 %829  ;;  %v1575_v33 = vpop.permute.xlu0 %638 }
 0x461   : > { %v1577_v34 = vpop.permute.xlu1 %860  ;;  %v1579_v35 = vpop.permute.xlu0 %673 }
 0x465   : > { %v727_v36 = vpop.permute.xlu0 %726  ;;  %v623_v37 = vpop.permute.xlu1 %622 }
 0x466   : > { %v732_v57 = vsel %vm731_vm6, %v730_v24, %v727_v36  ;;  %v735_v58 = vsel %vm731_vm6, %v727_v36, %v730_v24  ;;  %v629_v63 = vsel %vm628_vm7, %v1563_v25, %v623_v37  ;;  %v632_v1 = vsel %vm628_vm7, %v623_v37, %v1563_v25 }
 0x467   : > { %v746_v12 = vmul.f32 %v745_v44, %v735_v58  ;;  %v747_v13 = vmul.f32 %v745_v44, %v732_v57  ;;  %v645_v16 = vmul.f32 %v644_v45, %v632_v1  ;;  %v646_v17 = vmul.f32 %v644_v45, %v629_v63 }
 0x469   : > { %v1581_v38 = vpop.permute.xlu0 %704  ;;  %v1583_v31 = vpop.permute.xlu1 %660 }
 0x46a   : > { %v666_v14 = vsel %vm665_vm8, %v1567_v27, %v1583_v31  ;;  %v669_v15 = vsel %vm665_vm8, %v1583_v31, %v1567_v27 }
 0x46b   : > { %v1692_v37 = vmul.f32 %v679_v46, %v669_v15  ;;  %v1694_v31 = vmul.f32 %v679_v46, %v666_v14 }
 0x46d   : > { %v1593_v39 = vpop.permute.xlu0 %767  ;;  %v1595_v40 = vpop.permute.xlu1 %691 }
 0x46e   : > { %v770_v18 = vsel %vm769_vm9, %v1565_v26, %v1593_v39  ;;  %v774_v19 = vsel %vm769_vm9, %v1593_v39, %v1565_v26  ;;  %v697_v24 = vsel %vm696_vm10, %v1571_v30, %v1595_v40  ;;  %v700_v25 = vsel %vm696_vm10, %v1595_v40, %v1571_v30 }
 0x46f   : > { %v785_v45 = vmul.f32 %v784_v52, %v770_v18  ;;  %v786_v57 = vmul.f32 %v784_v52, %v774_v19  ;;  %v1710_v46 = vmul.f32 %v710_v53, %v700_v25 }
 0x471   : > { %v1609_v41 = vpop.permute.xlu0 %798  ;;  %v740_v42 = vpop.permute.xlu1 %739 }
 0x472   : > { %v801_v30 = vsel %vm800_vm11, %v1569_v28, %v1609_v41  ;;  %v805_v40 = vsel %vm800_vm11, %v1609_v41, %v1569_v28 }
 0x473   : > { %v816_v61 = vmul.f32 %v815_v4, %v801_v30  ;;  %v817_v15 = vmul.f32 %v815_v4, %v805_v40 }
 0x475   : > { %v1629_v48 = vpop.permute.xlu0 %831  ;;  %v1631_v49 = vpop.permute.xlu1 %775 }
 0x476   : > { %v834_v18 = vsel %vm833_vm12, %v1573_v32, %v1629_v48 }
 0x477   : > { %v849_v51 = vmul.f32 %v848_v54, %v834_v18 }
 0x479   : > { %v863_v59 = vpop.permute.xlu0 %862  ;;  %v1644_v60 = vpop.permute.xlu1 %806 }
 0x47a   : > { %v865_v19 = vsel %vm864_vm13, %v1577_v34, %v863_v59 }
 0x47d   : > { %v737_v20 = vpop.permute.xlu0 %736  ;;  %v1682_v22 = vpop.permute.xlu1 %839 }
 0x47e   : > { %v741_v27 = vsel %vm731_vm6, %v740_v42, %v737_v20  ;;  %v744_v36 = vsel %vm731_vm6, %v737_v20, %v740_v42  ;;  %vm656_vm6 = vmand %vm1654_vm14, %vm1696_vm0 }
 0x47f   : > { %v749_v26 = vmul.f32 %v748_v56, %v744_v36  ;;  %v750_v39 = vmul.f32 %v748_v56, %v741_v27  ;;  %v1712_v56 = vmul.f32 %v710_v53, %v697_v24  ;;  %v1770_v27 = vmul.f32 %v879_v55, %v865_v19 }
 0x481   : > { %v751_v58 = vadd.f32 %v749_v26, %v746_v12  ;;  %v752_v63 = vadd.f32 %v750_v39, %v747_v13  ;;  %v778_v1 = vpop.permute.xlu0 %777  ;;  %v635_v52 = vpop.permute.xlu1 %634 }
 0x482   : > { %v779_v28 = vsel %vm769_vm9, %v1631_v49, %v778_v1  ;;  %v783_v41 = vsel %vm769_vm9, %v778_v1, %v1631_v49  ;;  %v640_v53 = vsel %vm628_vm7, %v1575_v33, %v635_v52  ;;  %v643_v12 = vsel %vm628_vm7, %v635_v52, %v1575_v33  ;;  %vm657_vm7 = vmand %vm1660_vm15, %vm1706_vm1 }
 0x483   : > { %v838_v49 = vsel %vm833_vm12, %v1629_v48, %v1573_v32  ;;  %v869_v33 = vsel %vm864_vm13, %v863_v59, %v1577_v34  ;;  %v788_v32 = vmul.f32 %v787_v0, %v779_v28  ;;  %v789_v48 = vmul.f32 %v787_v0, %v783_v41  ;;  %vm826_vm9 = vmand %vm1660_vm15, %vm1726_vm3 }
 0x484   : > { %v753_v29 = vsel %vm1654_vm14, %v751_v58, 0.0  ;;  %v754_v34 = vsel %vm1660_vm15, %v752_v63, 0.0  ;;  %v648_v50 = vmul.f32 %v647_v62, %v643_v12  ;;  %v649_v59 = vmul.f32 %v647_v62, %v640_v53 }
 0x485   : > { %v809_v20 = vpop.permute.xlu0 %808  ;;  %v671_v43 = vpop.permute.xlu1 %670  ;;  %v850_v24 = vmul.f32 %v848_v54, %v838_v49  ;;  %v1774_v36 = vmul.f32 %v879_v55, %v869_v33  ;;  %v763_v54 = vadd.f32 %v1547_v21, %v753_v29  ;;  %v764_v39 = vadd.f32 %v1549_v23, %v754_v34 }
 0x486   : > { %v810_v25 = vsel %vm800_vm11, %v1644_v60, %v809_v20  ;;  %v814_v0 = vsel %vm800_vm11, %v809_v20, %v1644_v60  ;;  %v790_v30 = vadd.f32 %v788_v32, %v785_v45  ;;  %v791_v40 = vadd.f32 %v789_v48, %v786_v57  ;;  %vm721_vm11 = vmand %vm1748_vm5, %vm1706_vm1 }
 0x487   : > { %v819_v62 = vmul.f32 %v818_v6, %v810_v25  ;;  %v820_v26 = vmul.f32 %v818_v6, %v814_v0  ;;  %v650_v60 = vadd.f32 %v648_v50, %v645_v16  ;;  %v651_v58 = vadd.f32 %v649_v59, %v646_v17 }
 0x488   : > { %v675_v63 = vsel %vm665_vm8, %v1579_v35, %v671_v43  ;;  %v678_v55 = vsel %vm665_vm8, %v671_v43, %v1579_v35  ;;  %vm825_vm8 = vmand %vm1654_vm14, %vm1714_vm2  ;;  %v793_v19 = vsel %vm1748_vm5, %v791_v40, 0.0 }
 0x489   : > { %v842_v1 = vpop.permute.xlu0 %841  ;;  %v702_v52 = vpop.permute.xlu1 %701  ;;  %v683_v21 = vmul.f32 %v682_v7, %v678_v55  ;;  %v684_v23 = vmul.f32 %v682_v7, %v675_v63  ;;  %v821_v35 = vadd.f32 %v819_v62, %v816_v61  ;;  %v822_v17 = vadd.f32 %v820_v26, %v817_v15 }
 0x48a   : > { %v843_v6 = vsel %vm833_vm12, %v1682_v22, %v842_v1  ;;  %v847_v16 = vsel %vm833_vm12, %v842_v1, %v1682_v22  ;;  %v706_v28 = vsel %vm696_vm10, %v1581_v38, %v702_v52  ;;  %v709_v41 = vsel %vm696_vm10, %v702_v52, %v1581_v38  ;;  %vm720_vm10 = vmand %vm1742_vm4, %vm1696_vm0 }
 0x48b   : > { %v852_v45 = vmul.f32 %v851_v8, %v843_v6  ;;  %v853_v57 = vmul.f32 %v851_v8, %v847_v16  ;;  %v685_v7 = vadd.f32 %v683_v21, %v1692_v37  ;;  %v686_v22 = vadd.f32 %v684_v23, %v1694_v31  ;;  %vm887_vm12 = vmand %vm1742_vm4, %vm1714_vm2 }
 0x48c   : > { %v714_v12 = vmul.f32 %v713_v9, %v709_v41  ;;  %v715_v61 = vmul.f32 %v713_v9, %v706_v28  ;;  %v792_v9 = vsel %vm1742_vm4, %v790_v30, 0.0  ;;  %v658_v33 = vsel %vm656_vm6, %v650_v60, 0.0 }
 0x48d   : > { %v854_v8 = vadd.f32 %v852_v45, %v849_v51  ;;  %v855_v53 = vadd.f32 %v853_v57, %v850_v24  ;;  %v873_v37 = vpop.permute.xlu0 %872  ;;  %v871_v15 = vpop.permute.xlu1 %870  ;;  %v687_v31 = vsel %vm1696_vm0, %v685_v7, 0.0  ;;  %v688_v18 = vsel %vm1706_vm1, %v686_v22, 0.0 }
 0x48e   : > { %v874_v38 = vsel %vm864_vm13, %v871_v15, %v873_v37  ;;  %v878_v49 = vsel %vm864_vm13, %v873_v37, %v871_v15  ;;  %v659_v32 = vsel %vm657_vm7, %v651_v58, 0.0  ;;  %v689_v48 = vadd.f32 %v687_v31, %v658_v33  ;;  %vm888_vm13 = vmand %vm1748_vm5, %vm1726_vm3 }
 0x48f   : > { %v690_v29 = vadd.f32 %v688_v18, %v659_v32  ;;  %v716_v34 = vadd.f32 %v714_v12, %v1710_v46  ;;  %v717_v50 = vadd.f32 %v715_v61, %v1712_v56  ;;  %v856_v59 = vsel %vm1714_vm2, %v854_v8, 0.0 }
 0x490   : > { %v857_v20 = vsel %vm1726_vm3, %v855_v53, 0.0  ;;  %v883_v42 = vmul.f32 %v882_v11, %v874_v38  ;;  %v884_v43 = vmul.f32 %v882_v11, %v878_v49  ;;  %v827_v46 = vsel %vm825_vm8, %v821_v35, 0.0 }
 0x491   : > { %v828_v56 = vsel %vm826_vm9, %v822_v17, 0.0  ;;  %v722_v51 = vsel %vm720_vm10, %v716_v34, 0.0  ;;  %v723_v24 = vsel %vm721_vm11, %v717_v50, 0.0  ;;  %v794_v0 = vadd.f32 %v792_v9, %v763_v54 }
 0x492   : > { %v724_v2 = vadd.f32 %v722_v51, %v689_v48  ;;  %v725_v11 = vadd.f32 %v723_v24, %v690_v29  ;;  %v885_v3 = vadd.f32 %v883_v42, %v1770_v27  ;;  %v886_v25 = vadd.f32 %v884_v43, %v1774_v36 }
 0x493   : > { %v795_v62 = vadd.f32 %v793_v19, %v764_v39  ;;  %v858_v26 = vadd.f32 %v856_v59, %v827_v46  ;;  %v859_v30 = vadd.f32 %v857_v20, %v828_v56  ;;  %v898_v63 = vstv %s1852_s0 }
 0x494   : > { %v889_v44 = vsel %vm887_vm12, %v885_v3, 0.0  ;;  %v890_v13 = vsel %vm888_vm13, %v886_v25, 0.0  ;;  %v893_v5 = vadd.f32 %v794_v0, %v724_v2 }
 0x495   : > { %v894_v40 = vadd.f32 %v795_v62, %v725_v11  ;;  %v891_v60 = vadd.f32 %v889_v44, %v858_v26  ;;  %v892_v58 = vadd.f32 %v890_v13, %v859_v30 }
 0x497   : > { %v895_v55 = vadd.f32 %v893_v5, %v891_v60  ;;  %v896_v27 = vadd.f32 %v894_v40, %v892_v58 }
 0x499   : > { %v899_v1 = vadd.f32 %v898_v63, %v895_v55  ;;  %v900_v36 = vadd.f32 %v898_v63, %v896_v27 }
 0x49b   : > { %v1055_v54 = vmul.f32 -1.442695, %v899_v1  ;;  %v1056_v39 = vmul.f32 -1.442695, %v900_v36 }
 0x49d   : > { %1138 = vpow2.f32 %v1055_v54 }
 0x49e   : > { %1140 = vpow2.f32 %v1056_v39 }
 0x4a7   : > { %v1139_v4 = vpop.eup %1138 }
 0x4a8   : > { %v1141_v14 = vpop.eup %1140  ;;  %v907_v52 = vadd.f32 1.0, %v1139_v4 }
 0x4a9   : > { %v908_v21 = vadd.f32 1.0, %v1141_v14 }
 0x4aa   : > { %1142 = vrcp.f32 %v907_v52 }
 0x4ab   : > { %1144 = vrcp.f32 %v908_v21 }
 0x4b4   : > { %v1143_v23 = vpop.eup %1142 }
 0x4b5   : > { %v1145_v6 = vpop.eup %1144  ;;  %v916_v16 = vrot.slane %v1143_v23, %v1481_v10 }
 0x4b6   : > { %v920_v35 = vrot.slane %v1145_v6, %v1481_v10 }
 0x4b8   : > { %v923_v17 = vcombine.low %v916_v16, %v920_v35 }
 0x4ba   : > { %v925_v45 = vmul.f32 %v923_v17, %v1527_v47 }
 0x4bc   : > { %926 = vst [vmem:[%s309_s17] sm:$0xff] %v925_v45 }
 0x4bd   : > { %1204 = shalt.err (!%p1201_p5)
}
 0x4be   : > { %s1205_s18 = scalar_lea.hbm %s1904_s12, 128  ;;  %s1209_s15 = scalar_lea.hbm %s1955_s7, 256 }
 0x4bf   : > { %p1206_p10 = scmp.ne.s32.totalorder %s1904_s12, %s1205_s18  ;;  %p1210_p4 = scmp.lt.u32.totalorder %s1904_s12, %s1955_s7 }
 0x4c0   : > { %p1211_p6 = scmp.lt.u32.totalorder %s1209_s15, %s1205_s18  ;;  %p1213_p9 = scmp.lt.u32.totalorder %s1205_s18, %s1904_s12 }
 0x4c1   : > { %p1207_p2 = pnand %p1206_p10, %p1992_p11 }
 0x4c2   : > { %p1212_p8 = por %p1211_p6, %p1210_p4 }
 0x4c3   : > { %p1208_p1 = pneg %p1207_p2 }
 0x4c4   : > { %p1214_p13 = por %p1213_p9, %p1212_p8 }
 0x4c6   : > { %p1215_p7 = pnand %p1214_p13, %p1208_p1 }
 0x4c8   : > { %1218 = shalt.err (!%p1215_p7)
}
 0x4c9   : > { %1070 = dma.vmem_to_hbm [thread:$0]  (%p1992_p11), %s1906_s30, 128, %s1904_s12, %s928_s19  }
 0x4ca PF: > { %s954_s1 = sand.u32 1, %s1249_s26   ;;  %p1993_p0 = scmp.ne.s32.totalorder %s1963_s9, 0 }
 0x4cb   : > { %p1994_p3 = scmp.ge.s32.totalorder %s1261_s29, 2  ;;  %s955_s20 = scalar_lea.sflag [#allocation5], %s954_s1 }
 0x4cd   : > { %p1081_p12 = pnand %p1994_p3, %p1993_p0 }
 0x4cf   : > { %1244 = dma.done.wait (!%p1081_p12), %s955_s20, 128  }
 0x4d0   : > { %1246 = vsyncadd (!%p1081_p12), %s955_s20, 4294967168  ;;  %p22_p5 = scmp.ge.s32.totalorder %s1370_s14, 4   ;;  %s1995_s26 = smov %s1253_s27 }
 0x4d1   : > { %s1996_s27 = smov %s1257_s28  ;;  %s1997_s28 = smov %s1394_s21 }
 0x4d2   : > { %s1998_s29 = smov %s1370_s14  ;;  %24 = sbr.rel (!%p22_p5) target bundleno = 10 (0xa), region = 98 }
 0x4d9   :  { %960 = vsyncpa [#allocation4], 1 }
 0x4da   :  { %962 = vsyncpa [#allocation4 + $0x1], 1 }
 0x4db   :  { %963 = vsyncpa [#allocation5], 1 }
 0x4dc   :  { %965 = vsyncpa [#allocation5 + $0x1], 1 }
 0x4dd   :  { %966 = vsyncpa [#allocation6], 1 }
 0x4de   :  { %968 = vsyncpa [#allocation6 + $0x1], 1 }

</bundles_post_ra>
